<compile_context>
chip_gen: v7x
topology: tpu7x:2x2x1
jax: 0.10.0
libtpu: 0.0.40
codegen_flags: <defaults>
</compile_context>

<pallas_src>
import functools
import math

import jax
import jax.numpy as jnp
from jax.experimental import pallas as pl
from jax.experimental.pallas import tpu as pltpu


_PARAM_ORDER = ("wq", "bq", "wk", "bk", "wv", "bv", "wproj", "bproj",
                "g1", "b1", "wfc", "bfc", "wfp", "bfp", "g2", "b2")


def _transformer_kernel(num_layer, n_head, q_len,
                        x_ref, mask_ref, tidx_ref,
                        wq_ref, bq_ref, wk_ref, bk_ref, wv_ref, bv_ref,
                        wproj_ref, bproj_ref, g1_ref, b1_ref,
                        wfc_ref, bfc_ref, wfp_ref, bfp_ref, g2_ref, b2_ref,
                        out_ref):
    x = x_ref[...].astype(jnp.float32)          # (M, E) slab, M = rows per grid step
    M, E = x.shape

    # Hoisted invariants (computed once, shared by all layers / heads):
    # block-diagonal causal mask and within-sequence time index.
    mask = mask_ref[...] != 0.0                 # (M, M) bool
    t_idx = tidx_ref[...]                       # (M, 1) int32

    def layer_norm(v, g, b, eps=1e-5):
        mu = jnp.mean(v, axis=-1, keepdims=True)
        d = v - mu
        var = jnp.mean(d * d, axis=-1, keepdims=True)
        return g * (d * jax.lax.rsqrt(var + eps)) + b

    for l in range(num_layer):                  # static unroll: fused layer loop
        # ---- causal Conv1d via im2col: tap j sees x[t - (q_len-1) + j] ----
        taps = []
        for j in range(q_len):
            shift = q_len - 1 - j
            if shift == 0:
                taps.append(x)
            else:
                # Rows move forward in time; the roll wraps across sequence
                # boundaries, so zero rows whose time index < shift (causal pad).
                shifted = pltpu.roll(x, shift=shift, axis=0)
                taps.append(jnp.where(t_idx >= shift, shifted, 0.0))
        xs = jnp.concatenate(taps, axis=-1)     # (M, q_len*E): one MXU contraction axis

        # ---- attention: heads via pre-split weights (no lane slice / concat) ----
        attn = None
        for h in range(n_head):                 # static unroll, n_head is small
            qh = jnp.dot(xs, wq_ref[l, h], preferred_element_type=jnp.float32) + bq_ref[l, h]
            kh = jnp.dot(xs, wk_ref[l, h], preferred_element_type=jnp.float32) + bk_ref[l, h]
            vh = jnp.dot(x,  wv_ref[l, h], preferred_element_type=jnp.float32) + bv_ref[l, h]
            s = jnp.dot(qh, kh.T, preferred_element_type=jnp.float32)   # (M, M)
            s = jnp.where(mask, s, -1e9)        # exact -1e9 fill (matches reference)
            s = s - jnp.max(s, axis=-1, keepdims=True)
            p = jnp.exp(s)
            p = p * pl.reciprocal(jnp.sum(p, axis=-1, keepdims=True), approx=True)
            head = jnp.dot(p, vh, preferred_element_type=jnp.float32)   # (M, E)
            proj = jnp.dot(head, wproj_ref[l, h], preferred_element_type=jnp.float32)
            attn = proj if attn is None else attn + proj
        attn = attn + bproj_ref[l]

        ln1 = layer_norm(x + attn, g1_ref[l], b1_ref[l])

        # ---- MLP: (E -> 4E) ReLU (4E -> E) ----
        fc = jnp.maximum(
            jnp.dot(ln1, wfc_ref[l], preferred_element_type=jnp.float32) + bfc_ref[l], 0.0)
        mlp = jnp.dot(fc, wfp_ref[l], preferred_element_type=jnp.float32) + bfp_ref[l]

        x = layer_norm(ln1 + mlp, g2_ref[l], b2_ref[l])

    out_ref[...] = x.astype(out_ref.dtype)


def self_defined_transformer(x, y, po_embed, params, *, n_head, q_len, scale_att,
                             num_splits=1):
    """use_gcn=False path.  y is unused in this configuration (matches PyTorch)."""
    del y
    B, T, _ = x.shape
    n_embd = po_embed.shape[-1]
    pos = po_embed[:T]                                        # learnable position embedding
    emb = jnp.broadcast_to(pos[None], (B, T, n_embd))         # embedding_sum[:] = po_embedding
    h = jnp.concatenate([x, emb], axis=2)                     # (B, T, n_ts + n_embd)
    E = h.shape[-1]
    L = params["wq"].shape[0]

    p = dict(params)
    if scale_att:
        # Fold the 1/sqrt(E) attention scale into the query projection (weight + bias).
        p["wq"] = p["wq"] / math.sqrt(E)
        p["bq"] = p["bq"] / math.sqrt(E)
    weights = [p[k] for k in _PARAM_ORDER]

    if B % num_splits:
        raise ValueError("num_splits must divide the batch size")
    rows = (B // num_splits) * T                              # rows handled per grid step
    if num_splits > 1 and rows % 8:
        raise ValueError("rows per split must be a multiple of 8 when num_splits > 1")

    # Precomputed (hoisted) block-diagonal causal mask + within-sequence time
    # index; identical for every grid step, kept resident via constant specs.
    ii = jnp.arange(rows, dtype=jnp.int32)
    mask = ((ii[:, None] >= ii[None, :]) &
            ((ii[:, None] // T) == (ii[None, :] // T))).astype(jnp.float32)
    t_idx = (ii % T).reshape(rows, 1)

    h2d = h.reshape(B * T, E)                                 # collapse batch into one slab

    def const_spec(w):
        nd = w.ndim
        return pl.BlockSpec(w.shape, lambda i, _nd=nd: (0,) * _nd)

    kernel = functools.partial(_transformer_kernel, L, n_head, q_len)
    out2d = pl.pallas_call(
        kernel,
        out_shape=jax.ShapeDtypeStruct((B * T, E), h.dtype),
        grid_spec=pltpu.PrefetchScalarGridSpec(
            num_scalar_prefetch=0,
            grid=(num_splits,),
            in_specs=[pl.BlockSpec((rows, E), lambda i: (i, 0)),
                      const_spec(mask), const_spec(t_idx)]
                     + [const_spec(w) for w in weights],
            out_specs=pl.BlockSpec((rows, E), lambda i: (i, 0)),
        ),
        compiler_params=pltpu.CompilerParams(dimension_semantics=("parallel",)),
    )(h2d, mask, t_idx, *weights)
    return out2d.reshape(B, T, E)


def init_params(key, n_time_series, n_head, num_layer, n_embd, vocab_len, q_len):
    E = n_time_series + n_embd          # block embedding size (use_gcn=False)
    H, L = n_head, num_layer
    k_embed, k_w = jax.random.split(key)
    po_embed = 0.02 * jax.random.normal(k_embed, (vocab_len, n_embd), jnp.float32)
    ks = jax.random.split(k_w, 6)
    params = dict(
        # query/key causal-conv weights, pre-split per head; rows [j*E:(j+1)*E]
        # of the contraction axis correspond to conv tap j (x[t-(q_len-1)+j]).
        wq=0.02 * jax.random.normal(ks[0], (L, H, q_len * E, E), jnp.float32),
        bq=jnp.zeros((L, H, 1, E), jnp.float32),
        wk=0.02 * jax.random.normal(ks[1], (L, H, q_len * E, E), jnp.float32),
        bk=jnp.zeros((L, H, 1, E), jnp.float32),
        wv=0.02 * jax.random.normal(ks[2], (L, H, E, E), jnp.float32),
        bv=jnp.zeros((L, H, 1, E), jnp.float32),
        wproj=0.02 * jax.random.normal(ks[3], (L, H, E, E), jnp.float32),
        bproj=jnp.zeros((L, 1, E), jnp.float32),
        g1=jnp.ones((L, 1, E), jnp.float32),
        b1=jnp.zeros((L, 1, E), jnp.float32),
        wfc=0.02 * jax.random.normal(ks[4], (L, E, 4 * E), jnp.float32),
        bfc=jnp.zeros((L, 1, 4 * E), jnp.float32),
        wfp=0.02 * jax.random.normal(ks[5], (L, 4 * E, E), jnp.float32),
        bfp=jnp.zeros((L, 1, E), jnp.float32),
        g2=jnp.ones((L, 1, E), jnp.float32),
        b2=jnp.zeros((L, 1, E), jnp.float32),
    )
    return po_embed, params


if __name__ == "__main__":
    # Module hyper-parameters (small, consistent with the forward pass).
    n_time_series, n_embd, n_head = 4, 4, 2
    num_layer, vocab_len, q_len = 2, 16, 2       # win_len == vocab_len in the module
    scale_att = True
    B, T = 2, 8                                  # T <= vocab_len (causal mask size)

    key = jax.random.PRNGKey(0)
    kx, ky, kp = jax.random.split(key, 3)
    x = jax.random.normal(kx, (B, T, n_time_series), jnp.float32)
    y = jax.random.normal(ky, (n_time_series, n_time_series), jnp.float32)  # unused (use_gcn=False)

    po_embed, params = init_params(kp, n_time_series, n_head, num_layer,
                                   n_embd, vocab_len, q_len)

    out = self_defined_transformer(x, y, po_embed, params,
                                   n_head=n_head, q_len=q_len, scale_att=scale_att)
    out = jax.block_until_ready(out)
    assert out.shape == (B, T, n_time_series + n_embd)
    assert bool(jnp.all(jnp.isfinite(out)))
    print("KERNEL_OK")
</pallas_src>

<mosaic_0001>
module attributes {stable_mosaic.version = 11 : i64} {
  func.func @_transformer_kernel(%arg0: i32, %arg1: memref<16x8xf32, #tpu.memory_space<vmem>>, %arg2: memref<16x16xf32, #tpu.memory_space<vmem>>, %arg3: memref<16x1xi32, #tpu.memory_space<vmem>>, %arg4: memref<2x2x16x8xf32, #tpu.memory_space<vmem>>, %arg5: memref<2x2x1x8xf32, #tpu.memory_space<vmem>>, %arg6: memref<2x2x16x8xf32, #tpu.memory_space<vmem>>, %arg7: memref<2x2x1x8xf32, #tpu.memory_space<vmem>>, %arg8: memref<2x2x8x8xf32, #tpu.memory_space<vmem>>, %arg9: memref<2x2x1x8xf32, #tpu.memory_space<vmem>>, %arg10: memref<2x2x8x8xf32, #tpu.memory_space<vmem>>, %arg11: memref<2x1x8xf32, #tpu.memory_space<vmem>>, %arg12: memref<2x1x8xf32, #tpu.memory_space<vmem>>, %arg13: memref<2x1x8xf32, #tpu.memory_space<vmem>>, %arg14: memref<2x8x32xf32, #tpu.memory_space<vmem>>, %arg15: memref<2x1x32xf32, #tpu.memory_space<vmem>>, %arg16: memref<2x32x8xf32, #tpu.memory_space<vmem>>, %arg17: memref<2x1x8xf32, #tpu.memory_space<vmem>>, %arg18: memref<2x1x8xf32, #tpu.memory_space<vmem>>, %arg19: memref<2x1x8xf32, #tpu.memory_space<vmem>>, %arg20: memref<16x8xf32, #tpu.memory_space<vmem>>) attributes {dimension_semantics = [#tpu.dimension_semantics<parallel>], iteration_bounds = array<i64: 1>, scalar_prefetch = 0 : i64, scratch_operands = 0 : i64, tpu.core_type = #tpu.core_type<tc>, window_params = [{transform_indices = @transform_0, window_bounds = array<i64: 16, 8>}, {pipeline_mode = #tpu.pipeline_mode<synchronous>, transform_indices = @transform_1, window_bounds = array<i64: 16, 16>}, {pipeline_mode = #tpu.pipeline_mode<synchronous>, transform_indices = @transform_2, window_bounds = array<i64: 16, 1>}, {pipeline_mode = #tpu.pipeline_mode<synchronous>, transform_indices = @transform_3, window_bounds = array<i64: 2, 2, 16, 8>}, {pipeline_mode = #tpu.pipeline_mode<synchronous>, transform_indices = @transform_4, window_bounds = array<i64: 2, 2, 1, 8>}, {pipeline_mode = #tpu.pipeline_mode<synchronous>, transform_indices = @transform_5, window_bounds = array<i64: 2, 2, 16, 8>}, {pipeline_mode = #tpu.pipeline_mode<synchronous>, transform_indices = @transform_6, window_bounds = array<i64: 2, 2, 1, 8>}, {pipeline_mode = #tpu.pipeline_mode<synchronous>, transform_indices = @transform_7, window_bounds = array<i64: 2, 2, 8, 8>}, {pipeline_mode = #tpu.pipeline_mode<synchronous>, transform_indices = @transform_8, window_bounds = array<i64: 2, 2, 1, 8>}, {pipeline_mode = #tpu.pipeline_mode<synchronous>, transform_indices = @transform_9, window_bounds = array<i64: 2, 2, 8, 8>}, {pipeline_mode = #tpu.pipeline_mode<synchronous>, transform_indices = @transform_10, window_bounds = array<i64: 2, 1, 8>}, {pipeline_mode = #tpu.pipeline_mode<synchronous>, transform_indices = @transform_11, window_bounds = array<i64: 2, 1, 8>}, {pipeline_mode = #tpu.pipeline_mode<synchronous>, transform_indices = @transform_12, window_bounds = array<i64: 2, 1, 8>}, {pipeline_mode = #tpu.pipeline_mode<synchronous>, transform_indices = @transform_13, window_bounds = array<i64: 2, 8, 32>}, {pipeline_mode = #tpu.pipeline_mode<synchronous>, transform_indices = @transform_14, window_bounds = array<i64: 2, 1, 32>}, {pipeline_mode = #tpu.pipeline_mode<synchronous>, transform_indices = @transform_15, window_bounds = array<i64: 2, 32, 8>}, {pipeline_mode = #tpu.pipeline_mode<synchronous>, transform_indices = @transform_16, window_bounds = array<i64: 2, 1, 8>}, {pipeline_mode = #tpu.pipeline_mode<synchronous>, transform_indices = @transform_17, window_bounds = array<i64: 2, 1, 8>}, {pipeline_mode = #tpu.pipeline_mode<synchronous>, transform_indices = @transform_18, window_bounds = array<i64: 2, 1, 8>}, {transform_indices = @transform_19, window_bounds = array<i64: 16, 8>}]} {
    %c0 = arith.constant 0 : index
    %c0_0 = arith.constant 0 : index
    %0 = vector.load %arg1[%c0, %c0_0] : memref<16x8xf32, #tpu.memory_space<vmem>>, vector<16x8xf32>
    %c0_1 = arith.constant 0 : index
    %c0_2 = arith.constant 0 : index
    %1 = vector.load %arg2[%c0_1, %c0_2] : memref<16x16xf32, #tpu.memory_space<vmem>>, vector<16x16xf32>
    %cst = arith.constant 0.000000e+00 : f32
    %2 = vector.broadcast %cst : f32 to vector<16x16xf32>
    %3 = arith.cmpf one, %1, %2 : vector<16x16xf32>
    %c0_3 = arith.constant 0 : index
    %c0_4 = arith.constant 0 : index
    %4 = vector.load %arg3[%c0_3, %c0_4] : memref<16x1xi32, #tpu.memory_space<vmem>>, vector<16x1xi32>
    %c1_i32 = arith.constant 1 : i32
    %5 = tpu.dynamic_rotate %0 by %c1_i32 dim 0 : vector<16x8xf32>, i32 -> vector<16x8xf32>
    %c1_i32_5 = arith.constant 1 : i32
    %6 = vector.broadcast %c1_i32_5 : i32 to vector<16x1xi32>
    %7 = arith.cmpi sge, %4, %6 : vector<16x1xi32>
    %cst_6 = arith.constant 0.000000e+00 : f32
    %8 = vector.shape_cast %7 : vector<16x1xi1> to vector<16x1xi1>
    %9 = vector.broadcast %8 : vector<16x1xi1> to vector<16x8xi1>
    %10 = vector.broadcast %cst_6 : f32 to vector<16x8xf32>
    %11 = arith.select %9, %5, %10 : vector<16x8xi1>, vector<16x8xf32>
    %12 = tpu.concatenate %11, %0 in 1 : vector<16x8xf32>, vector<16x8xf32> -> vector<16x16xf32>
    %c0_7 = arith.constant 0 : index
    %c0_8 = arith.constant 0 : index
    %c0_9 = arith.constant 0 : index
    %c0_10 = arith.constant 0 : index
    %13 = vector.load %arg4[%c0_7, %c0_8, %c0_9, %c0_10] : memref<2x2x16x8xf32, #tpu.memory_space<vmem>>, vector<1x1x16x8xf32>
    %14 = vector.shape_cast %13 : vector<1x1x16x8xf32> to vector<16x8xf32>
    %cst_11 = arith.constant dense<0.000000e+00> : vector<16x8xf32>
    %15 = tpu.matmul %12, %14, %cst_11 {dimension_numbers = #tpu.dot_dimension_numbers<[1], [0], [0], [1], [0, 0, 1, 1], [], []>} : vector<16x16xf32>, vector<16x8xf32>, vector<16x8xf32> -> vector<16x8xf32>
    %c0_12 = arith.constant 0 : index
    %c0_13 = arith.constant 0 : index
    %c0_14 = arith.constant 0 : index
    %c0_15 = arith.constant 0 : index
    %16 = vector.load %arg5[%c0_12, %c0_13, %c0_14, %c0_15] : memref<2x2x1x8xf32, #tpu.memory_space<vmem>>, vector<1x1x1x8xf32>
    %17 = vector.shape_cast %16 : vector<1x1x1x8xf32> to vector<1x8xf32>
    %18 = vector.broadcast %17 : vector<1x8xf32> to vector<16x8xf32>
    %19 = arith.addf %15, %18 : vector<16x8xf32>
    %c0_16 = arith.constant 0 : index
    %c0_17 = arith.constant 0 : index
    %c0_18 = arith.constant 0 : index
    %c0_19 = arith.constant 0 : index
    %20 = vector.load %arg6[%c0_16, %c0_17, %c0_18, %c0_19] : memref<2x2x16x8xf32, #tpu.memory_space<vmem>>, vector<1x1x16x8xf32>
    %21 = vector.shape_cast %20 : vector<1x1x16x8xf32> to vector<16x8xf32>
    %cst_20 = arith.constant dense<0.000000e+00> : vector<16x8xf32>
    %22 = tpu.matmul %12, %21, %cst_20 {dimension_numbers = #tpu.dot_dimension_numbers<[1], [0], [0], [1], [0, 0, 1, 1], [], []>} : vector<16x16xf32>, vector<16x8xf32>, vector<16x8xf32> -> vector<16x8xf32>
    %c0_21 = arith.constant 0 : index
    %c0_22 = arith.constant 0 : index
    %c0_23 = arith.constant 0 : index
    %c0_24 = arith.constant 0 : index
    %23 = vector.load %arg7[%c0_21, %c0_22, %c0_23, %c0_24] : memref<2x2x1x8xf32, #tpu.memory_space<vmem>>, vector<1x1x1x8xf32>
    %24 = vector.shape_cast %23 : vector<1x1x1x8xf32> to vector<1x8xf32>
    %25 = vector.broadcast %24 : vector<1x8xf32> to vector<16x8xf32>
    %26 = arith.addf %22, %25 : vector<16x8xf32>
    %c0_25 = arith.constant 0 : index
    %c0_26 = arith.constant 0 : index
    %c0_27 = arith.constant 0 : index
    %c0_28 = arith.constant 0 : index
    %27 = vector.load %arg8[%c0_25, %c0_26, %c0_27, %c0_28] : memref<2x2x8x8xf32, #tpu.memory_space<vmem>>, vector<1x1x8x8xf32>
    %28 = vector.shape_cast %27 : vector<1x1x8x8xf32> to vector<8x8xf32>
    %cst_29 = arith.constant dense<0.000000e+00> : vector<16x8xf32>
    %29 = tpu.matmul %0, %28, %cst_29 {dimension_numbers = #tpu.dot_dimension_numbers<[1], [0], [0], [1], [0, 0, 1, 1], [], []>} : vector<16x8xf32>, vector<8x8xf32>, vector<16x8xf32> -> vector<16x8xf32>
    %c0_30 = arith.constant 0 : index
    %c0_31 = arith.constant 0 : index
    %c0_32 = arith.constant 0 : index
    %c0_33 = arith.constant 0 : index
    %30 = vector.load %arg9[%c0_30, %c0_31, %c0_32, %c0_33] : memref<2x2x1x8xf32, #tpu.memory_space<vmem>>, vector<1x1x1x8xf32>
    %31 = vector.shape_cast %30 : vector<1x1x1x8xf32> to vector<1x8xf32>
    %32 = vector.broadcast %31 : vector<1x8xf32> to vector<16x8xf32>
    %33 = arith.addf %29, %32 : vector<16x8xf32>
    %34 = tpu.transpose %26, [1, 0] : vector<16x8xf32> -> vector<8x16xf32>
    %cst_34 = arith.constant dense<0.000000e+00> : vector<16x16xf32>
    %35 = tpu.matmul %19, %34, %cst_34 {dimension_numbers = #tpu.dot_dimension_numbers<[1], [0], [0], [1], [0, 0, 1, 1], [], []>} : vector<16x8xf32>, vector<8x16xf32>, vector<16x16xf32> -> vector<16x16xf32>
    %cst_35 = arith.constant -1.000000e+09 : f32
    %36 = vector.broadcast %cst_35 : f32 to vector<16x16xf32>
    %37 = arith.select %3, %35, %36 : vector<16x16xi1>, vector<16x16xf32>
    %cst_36 = arith.constant dense<0xFF800000> : vector<16xf32>
    %38 = vector.multi_reduction <maximumf>, %37, %cst_36 [1] : vector<16x16xf32> to vector<16xf32>
    %39 = vector.shape_cast %38 : vector<16xf32> to vector<16x1xf32>
    %40 = vector.broadcast %39 : vector<16x1xf32> to vector<16x16xf32>
    %41 = arith.subf %37, %40 : vector<16x16xf32>
    %42 = math.exp %41 : vector<16x16xf32>
    %cst_37 = arith.constant dense<0.000000e+00> : vector<16xf32>
    %43 = vector.multi_reduction <add>, %42, %cst_37 [1] : vector<16x16xf32> to vector<16xf32>
    %44 = vector.shape_cast %43 : vector<16xf32> to vector<16x1xf32>
    %45 = tpu.reciprocal %44 {approx = true} : vector<16x1xf32> -> vector<16x1xf32>
    %46 = vector.broadcast %45 : vector<16x1xf32> to vector<16x16xf32>
    %47 = arith.mulf %42, %46 : vector<16x16xf32>
    %cst_38 = arith.constant dense<0.000000e+00> : vector<16x8xf32>
    %48 = tpu.matmul %47, %33, %cst_38 {dimension_numbers = #tpu.dot_dimension_numbers<[1], [0], [0], [1], [0, 0, 1, 1], [], []>} : vector<16x16xf32>, vector<16x8xf32>, vector<16x8xf32> -> vector<16x8xf32>
    %c0_39 = arith.constant 0 : index
    %c0_40 = arith.constant 0 : index
    %c0_41 = arith.constant 0 : index
    %c0_42 = arith.constant 0 : index
    %49 = vector.load %arg10[%c0_39, %c0_40, %c0_41, %c0_42] : memref<2x2x8x8xf32, #tpu.memory_space<vmem>>, vector<1x1x8x8xf32>
    %50 = vector.shape_cast %49 : vector<1x1x8x8xf32> to vector<8x8xf32>
    %cst_43 = arith.constant dense<0.000000e+00> : vector<16x8xf32>
    %51 = tpu.matmul %48, %50, %cst_43 {dimension_numbers = #tpu.dot_dimension_numbers<[1], [0], [0], [1], [0, 0, 1, 1], [], []>} : vector<16x8xf32>, vector<8x8xf32>, vector<16x8xf32> -> vector<16x8xf32>
    %c0_44 = arith.constant 0 : index
    %c1 = arith.constant 1 : index
    %c0_45 = arith.constant 0 : index
    %c0_46 = arith.constant 0 : index
    %52 = vector.load %arg4[%c0_44, %c1, %c0_45, %c0_46] : memref<2x2x16x8xf32, #tpu.memory_space<vmem>>, vector<1x1x16x8xf32>
    %53 = vector.shape_cast %52 : vector<1x1x16x8xf32> to vector<16x8xf32>
    %cst_47 = arith.constant dense<0.000000e+00> : vector<16x8xf32>
    %54 = tpu.matmul %12, %53, %cst_47 {dimension_numbers = #tpu.dot_dimension_numbers<[1], [0], [0], [1], [0, 0, 1, 1], [], []>} : vector<16x16xf32>, vector<16x8xf32>, vector<16x8xf32> -> vector<16x8xf32>
    %c0_48 = arith.constant 0 : index
    %c1_49 = arith.constant 1 : index
    %c0_50 = arith.constant 0 : index
    %c0_51 = arith.constant 0 : index
    %55 = vector.load %arg5[%c0_48, %c1_49, %c0_50, %c0_51] : memref<2x2x1x8xf32, #tpu.memory_space<vmem>>, vector<1x1x1x8xf32>
    %56 = vector.shape_cast %55 : vector<1x1x1x8xf32> to vector<1x8xf32>
    %57 = vector.broadcast %56 : vector<1x8xf32> to vector<16x8xf32>
    %58 = arith.addf %54, %57 : vector<16x8xf32>
    %c0_52 = arith.constant 0 : index
    %c1_53 = arith.constant 1 : index
    %c0_54 = arith.constant 0 : index
    %c0_55 = arith.constant 0 : index
    %59 = vector.load %arg6[%c0_52, %c1_53, %c0_54, %c0_55] : memref<2x2x16x8xf32, #tpu.memory_space<vmem>>, vector<1x1x16x8xf32>
    %60 = vector.shape_cast %59 : vector<1x1x16x8xf32> to vector<16x8xf32>
    %cst_56 = arith.constant dense<0.000000e+00> : vector<16x8xf32>
    %61 = tpu.matmul %12, %60, %cst_56 {dimension_numbers = #tpu.dot_dimension_numbers<[1], [0], [0], [1], [0, 0, 1, 1], [], []>} : vector<16x16xf32>, vector<16x8xf32>, vector<16x8xf32> -> vector<16x8xf32>
    %c0_57 = arith.constant 0 : index
    %c1_58 = arith.constant 1 : index
    %c0_59 = arith.constant 0 : index
    %c0_60 = arith.constant 0 : index
    %62 = vector.load %arg7[%c0_57, %c1_58, %c0_59, %c0_60] : memref<2x2x1x8xf32, #tpu.memory_space<vmem>>, vector<1x1x1x8xf32>
    %63 = vector.shape_cast %62 : vector<1x1x1x8xf32> to vector<1x8xf32>
    %64 = vector.broadcast %63 : vector<1x8xf32> to vector<16x8xf32>
    %65 = arith.addf %61, %64 : vector<16x8xf32>
    %c0_61 = arith.constant 0 : index
    %c1_62 = arith.constant 1 : index
    %c0_63 = arith.constant 0 : index
    %c0_64 = arith.constant 0 : index
    %66 = vector.load %arg8[%c0_61, %c1_62, %c0_63, %c0_64] : memref<2x2x8x8xf32, #tpu.memory_space<vmem>>, vector<1x1x8x8xf32>
    %67 = vector.shape_cast %66 : vector<1x1x8x8xf32> to vector<8x8xf32>
    %cst_65 = arith.constant dense<0.000000e+00> : vector<16x8xf32>
    %68 = tpu.matmul %0, %67, %cst_65 {dimension_numbers = #tpu.dot_dimension_numbers<[1], [0], [0], [1], [0, 0, 1, 1], [], []>} : vector<16x8xf32>, vector<8x8xf32>, vector<16x8xf32> -> vector<16x8xf32>
    %c0_66 = arith.constant 0 : index
    %c1_67 = arith.constant 1 : index
    %c0_68 = arith.constant 0 : index
    %c0_69 = arith.constant 0 : index
    %69 = vector.load %arg9[%c0_66, %c1_67, %c0_68, %c0_69] : memref<2x2x1x8xf32, #tpu.memory_space<vmem>>, vector<1x1x1x8xf32>
    %70 = vector.shape_cast %69 : vector<1x1x1x8xf32> to vector<1x8xf32>
    %71 = vector.broadcast %70 : vector<1x8xf32> to vector<16x8xf32>
    %72 = arith.addf %68, %71 : vector<16x8xf32>
    %73 = tpu.transpose %65, [1, 0] : vector<16x8xf32> -> vector<8x16xf32>
    %cst_70 = arith.constant dense<0.000000e+00> : vector<16x16xf32>
    %74 = tpu.matmul %58, %73, %cst_70 {dimension_numbers = #tpu.dot_dimension_numbers<[1], [0], [0], [1], [0, 0, 1, 1], [], []>} : vector<16x8xf32>, vector<8x16xf32>, vector<16x16xf32> -> vector<16x16xf32>
    %cst_71 = arith.constant -1.000000e+09 : f32
    %75 = vector.broadcast %cst_71 : f32 to vector<16x16xf32>
    %76 = arith.select %3, %74, %75 : vector<16x16xi1>, vector<16x16xf32>
    %cst_72 = arith.constant dense<0xFF800000> : vector<16xf32>
    %77 = vector.multi_reduction <maximumf>, %76, %cst_72 [1] : vector<16x16xf32> to vector<16xf32>
    %78 = vector.shape_cast %77 : vector<16xf32> to vector<16x1xf32>
    %79 = vector.broadcast %78 : vector<16x1xf32> to vector<16x16xf32>
    %80 = arith.subf %76, %79 : vector<16x16xf32>
    %81 = math.exp %80 : vector<16x16xf32>
    %cst_73 = arith.constant dense<0.000000e+00> : vector<16xf32>
    %82 = vector.multi_reduction <add>, %81, %cst_73 [1] : vector<16x16xf32> to vector<16xf32>
    %83 = vector.shape_cast %82 : vector<16xf32> to vector<16x1xf32>
    %84 = tpu.reciprocal %83 {approx = true} : vector<16x1xf32> -> vector<16x1xf32>
    %85 = vector.broadcast %84 : vector<16x1xf32> to vector<16x16xf32>
    %86 = arith.mulf %81, %85 : vector<16x16xf32>
    %cst_74 = arith.constant dense<0.000000e+00> : vector<16x8xf32>
    %87 = tpu.matmul %86, %72, %cst_74 {dimension_numbers = #tpu.dot_dimension_numbers<[1], [0], [0], [1], [0, 0, 1, 1], [], []>} : vector<16x16xf32>, vector<16x8xf32>, vector<16x8xf32> -> vector<16x8xf32>
    %c0_75 = arith.constant 0 : index
    %c1_76 = arith.constant 1 : index
    %c0_77 = arith.constant 0 : index
    %c0_78 = arith.constant 0 : index
    %88 = vector.load %arg10[%c0_75, %c1_76, %c0_77, %c0_78] : memref<2x2x8x8xf32, #tpu.memory_space<vmem>>, vector<1x1x8x8xf32>
    %89 = vector.shape_cast %88 : vector<1x1x8x8xf32> to vector<8x8xf32>
    %cst_79 = arith.constant dense<0.000000e+00> : vector<16x8xf32>
    %90 = tpu.matmul %87, %89, %cst_79 {dimension_numbers = #tpu.dot_dimension_numbers<[1], [0], [0], [1], [0, 0, 1, 1], [], []>} : vector<16x8xf32>, vector<8x8xf32>, vector<16x8xf32> -> vector<16x8xf32>
    %91 = arith.addf %51, %90 : vector<16x8xf32>
    %c0_80 = arith.constant 0 : index
    %c0_81 = arith.constant 0 : index
    %c0_82 = arith.constant 0 : index
    %92 = vector.load %arg11[%c0_80, %c0_81, %c0_82] : memref<2x1x8xf32, #tpu.memory_space<vmem>>, vector<1x1x8xf32>
    %93 = vector.shape_cast %92 : vector<1x1x8xf32> to vector<1x8xf32>
    %94 = vector.broadcast %93 : vector<1x8xf32> to vector<16x8xf32>
    %95 = arith.addf %91, %94 : vector<16x8xf32>
    %96 = arith.addf %0, %95 : vector<16x8xf32>
    %c0_83 = arith.constant 0 : index
    %c0_84 = arith.constant 0 : index
    %c0_85 = arith.constant 0 : index
    %97 = vector.load %arg12[%c0_83, %c0_84, %c0_85] : memref<2x1x8xf32, #tpu.memory_space<vmem>>, vector<1x1x8xf32>
    %98 = vector.shape_cast %97 : vector<1x1x8xf32> to vector<1x8xf32>
    %c0_86 = arith.constant 0 : index
    %c0_87 = arith.constant 0 : index
    %c0_88 = arith.constant 0 : index
    %99 = vector.load %arg13[%c0_86, %c0_87, %c0_88] : memref<2x1x8xf32, #tpu.memory_space<vmem>>, vector<1x1x8xf32>
    %100 = vector.shape_cast %99 : vector<1x1x8xf32> to vector<1x8xf32>
    %cst_89 = arith.constant dense<0.000000e+00> : vector<16xf32>
    %101 = vector.multi_reduction <add>, %96, %cst_89 [1] : vector<16x8xf32> to vector<16xf32>
    %102 = vector.shape_cast %101 : vector<16xf32> to vector<16x1xf32>
    %cst_90 = arith.constant 8.000000e+00 : f32
    %103 = vector.broadcast %cst_90 : f32 to vector<16x1xf32>
    %104 = arith.divf %102, %103 : vector<16x1xf32>
    %105 = vector.broadcast %104 : vector<16x1xf32> to vector<16x8xf32>
    %106 = arith.subf %96, %105 : vector<16x8xf32>
    %107 = arith.mulf %106, %106 : vector<16x8xf32>
    %cst_91 = arith.constant dense<0.000000e+00> : vector<16xf32>
    %108 = vector.multi_reduction <add>, %107, %cst_91 [1] : vector<16x8xf32> to vector<16xf32>
    %109 = vector.shape_cast %108 : vector<16xf32> to vector<16x1xf32>
    %cst_92 = arith.constant 8.000000e+00 : f32
    %110 = vector.broadcast %cst_92 : f32 to vector<16x1xf32>
    %111 = arith.divf %109, %110 : vector<16x1xf32>
    %cst_93 = arith.constant 9.99999974E-6 : f32
    %112 = vector.broadcast %cst_93 : f32 to vector<16x1xf32>
    %113 = arith.addf %111, %112 : vector<16x1xf32>
    %114 = math.rsqrt %113 : vector<16x1xf32>
    %115 = vector.broadcast %114 : vector<16x1xf32> to vector<16x8xf32>
    %116 = arith.mulf %106, %115 : vector<16x8xf32>
    %117 = vector.broadcast %98 : vector<1x8xf32> to vector<16x8xf32>
    %118 = arith.mulf %117, %116 : vector<16x8xf32>
    %119 = vector.broadcast %100 : vector<1x8xf32> to vector<16x8xf32>
    %120 = arith.addf %118, %119 : vector<16x8xf32>
    %c0_94 = arith.constant 0 : index
    %c0_95 = arith.constant 0 : index
    %c0_96 = arith.constant 0 : index
    %121 = vector.load %arg14[%c0_94, %c0_95, %c0_96] : memref<2x8x32xf32, #tpu.memory_space<vmem>>, vector<1x8x32xf32>
    %122 = vector.shape_cast %121 : vector<1x8x32xf32> to vector<8x32xf32>
    %cst_97 = arith.constant dense<0.000000e+00> : vector<16x32xf32>
    %123 = tpu.matmul %120, %122, %cst_97 {dimension_numbers = #tpu.dot_dimension_numbers<[1], [0], [0], [1], [0, 0, 1, 1], [], []>} : vector<16x8xf32>, vector<8x32xf32>, vector<16x32xf32> -> vector<16x32xf32>
    %c0_98 = arith.constant 0 : index
    %c0_99 = arith.constant 0 : index
    %c0_100 = arith.constant 0 : index
    %124 = vector.load %arg15[%c0_98, %c0_99, %c0_100] : memref<2x1x32xf32, #tpu.memory_space<vmem>>, vector<1x1x32xf32>
    %125 = vector.shape_cast %124 : vector<1x1x32xf32> to vector<1x32xf32>
    %126 = vector.broadcast %125 : vector<1x32xf32> to vector<16x32xf32>
    %127 = arith.addf %123, %126 : vector<16x32xf32>
    %cst_101 = arith.constant 0.000000e+00 : f32
    %128 = vector.broadcast %cst_101 : f32 to vector<16x32xf32>
    %129 = arith.maximumf %127, %128 : vector<16x32xf32>
    %c0_102 = arith.constant 0 : index
    %c0_103 = arith.constant 0 : index
    %c0_104 = arith.constant 0 : index
    %130 = vector.load %arg16[%c0_102, %c0_103, %c0_104] : memref<2x32x8xf32, #tpu.memory_space<vmem>>, vector<1x32x8xf32>
    %131 = vector.shape_cast %130 : vector<1x32x8xf32> to vector<32x8xf32>
    %cst_105 = arith.constant dense<0.000000e+00> : vector<16x8xf32>
    %132 = tpu.matmul %129, %131, %cst_105 {dimension_numbers = #tpu.dot_dimension_numbers<[1], [0], [0], [1], [0, 0, 1, 1], [], []>} : vector<16x32xf32>, vector<32x8xf32>, vector<16x8xf32> -> vector<16x8xf32>
    %c0_106 = arith.constant 0 : index
    %c0_107 = arith.constant 0 : index
    %c0_108 = arith.constant 0 : index
    %133 = vector.load %arg17[%c0_106, %c0_107, %c0_108] : memref<2x1x8xf32, #tpu.memory_space<vmem>>, vector<1x1x8xf32>
    %134 = vector.shape_cast %133 : vector<1x1x8xf32> to vector<1x8xf32>
    %135 = vector.broadcast %134 : vector<1x8xf32> to vector<16x8xf32>
    %136 = arith.addf %132, %135 : vector<16x8xf32>
    %137 = arith.addf %120, %136 : vector<16x8xf32>
    %c0_109 = arith.constant 0 : index
    %c0_110 = arith.constant 0 : index
    %c0_111 = arith.constant 0 : index
    %138 = vector.load %arg18[%c0_109, %c0_110, %c0_111] : memref<2x1x8xf32, #tpu.memory_space<vmem>>, vector<1x1x8xf32>
    %139 = vector.shape_cast %138 : vector<1x1x8xf32> to vector<1x8xf32>
    %c0_112 = arith.constant 0 : index
    %c0_113 = arith.constant 0 : index
    %c0_114 = arith.constant 0 : index
    %140 = vector.load %arg19[%c0_112, %c0_113, %c0_114] : memref<2x1x8xf32, #tpu.memory_space<vmem>>, vector<1x1x8xf32>
    %141 = vector.shape_cast %140 : vector<1x1x8xf32> to vector<1x8xf32>
    %cst_115 = arith.constant dense<0.000000e+00> : vector<16xf32>
    %142 = vector.multi_reduction <add>, %137, %cst_115 [1] : vector<16x8xf32> to vector<16xf32>
    %143 = vector.shape_cast %142 : vector<16xf32> to vector<16x1xf32>
    %cst_116 = arith.constant 8.000000e+00 : f32
    %144 = vector.broadcast %cst_116 : f32 to vector<16x1xf32>
    %145 = arith.divf %143, %144 : vector<16x1xf32>
    %146 = vector.broadcast %145 : vector<16x1xf32> to vector<16x8xf32>
    %147 = arith.subf %137, %146 : vector<16x8xf32>
    %148 = arith.mulf %147, %147 : vector<16x8xf32>
    %cst_117 = arith.constant dense<0.000000e+00> : vector<16xf32>
    %149 = vector.multi_reduction <add>, %148, %cst_117 [1] : vector<16x8xf32> to vector<16xf32>
    %150 = vector.shape_cast %149 : vector<16xf32> to vector<16x1xf32>
    %cst_118 = arith.constant 8.000000e+00 : f32
    %151 = vector.broadcast %cst_118 : f32 to vector<16x1xf32>
    %152 = arith.divf %150, %151 : vector<16x1xf32>
    %cst_119 = arith.constant 9.99999974E-6 : f32
    %153 = vector.broadcast %cst_119 : f32 to vector<16x1xf32>
    %154 = arith.addf %152, %153 : vector<16x1xf32>
    %155 = math.rsqrt %154 : vector<16x1xf32>
    %156 = vector.broadcast %155 : vector<16x1xf32> to vector<16x8xf32>
    %157 = arith.mulf %147, %156 : vector<16x8xf32>
    %158 = vector.broadcast %139 : vector<1x8xf32> to vector<16x8xf32>
    %159 = arith.mulf %158, %157 : vector<16x8xf32>
    %160 = vector.broadcast %141 : vector<1x8xf32> to vector<16x8xf32>
    %161 = arith.addf %159, %160 : vector<16x8xf32>
    %c1_i32_120 = arith.constant 1 : i32
    %162 = tpu.dynamic_rotate %161 by %c1_i32_120 dim 0 : vector<16x8xf32>, i32 -> vector<16x8xf32>
    %c1_i32_121 = arith.constant 1 : i32
    %163 = vector.broadcast %c1_i32_121 : i32 to vector<16x1xi32>
    %164 = arith.cmpi sge, %4, %163 : vector<16x1xi32>
    %cst_122 = arith.constant 0.000000e+00 : f32
    %165 = vector.shape_cast %164 : vector<16x1xi1> to vector<16x1xi1>
    %166 = vector.broadcast %165 : vector<16x1xi1> to vector<16x8xi1>
    %167 = vector.broadcast %cst_122 : f32 to vector<16x8xf32>
    %168 = arith.select %166, %162, %167 : vector<16x8xi1>, vector<16x8xf32>
    %169 = tpu.concatenate %168, %161 in 1 : vector<16x8xf32>, vector<16x8xf32> -> vector<16x16xf32>
    %c1_123 = arith.constant 1 : index
    %c0_124 = arith.constant 0 : index
    %c0_125 = arith.constant 0 : index
    %c0_126 = arith.constant 0 : index
    %170 = vector.load %arg4[%c1_123, %c0_124, %c0_125, %c0_126] : memref<2x2x16x8xf32, #tpu.memory_space<vmem>>, vector<1x1x16x8xf32>
    %171 = vector.shape_cast %170 : vector<1x1x16x8xf32> to vector<16x8xf32>
    %cst_127 = arith.constant dense<0.000000e+00> : vector<16x8xf32>
    %172 = tpu.matmul %169, %171, %cst_127 {dimension_numbers = #tpu.dot_dimension_numbers<[1], [0], [0], [1], [0, 0, 1, 1], [], []>} : vector<16x16xf32>, vector<16x8xf32>, vector<16x8xf32> -> vector<16x8xf32>
    %c1_128 = arith.constant 1 : index
    %c0_129 = arith.constant 0 : index
    %c0_130 = arith.constant 0 : index
    %c0_131 = arith.constant 0 : index
    %173 = vector.load %arg5[%c1_128, %c0_129, %c0_130, %c0_131] : memref<2x2x1x8xf32, #tpu.memory_space<vmem>>, vector<1x1x1x8xf32>
    %174 = vector.shape_cast %173 : vector<1x1x1x8xf32> to vector<1x8xf32>
    %175 = vector.broadcast %174 : vector<1x8xf32> to vector<16x8xf32>
    %176 = arith.addf %172, %175 : vector<16x8xf32>
    %c1_132 = arith.constant 1 : index
    %c0_133 = arith.constant 0 : index
    %c0_134 = arith.constant 0 : index
    %c0_135 = arith.constant 0 : index
    %177 = vector.load %arg6[%c1_132, %c0_133, %c0_134, %c0_135] : memref<2x2x16x8xf32, #tpu.memory_space<vmem>>, vector<1x1x16x8xf32>
    %178 = vector.shape_cast %177 : vector<1x1x16x8xf32> to vector<16x8xf32>
    %cst_136 = arith.constant dense<0.000000e+00> : vector<16x8xf32>
    %179 = tpu.matmul %169, %178, %cst_136 {dimension_numbers = #tpu.dot_dimension_numbers<[1], [0], [0], [1], [0, 0, 1, 1], [], []>} : vector<16x16xf32>, vector<16x8xf32>, vector<16x8xf32> -> vector<16x8xf32>
    %c1_137 = arith.constant 1 : index
    %c0_138 = arith.constant 0 : index
    %c0_139 = arith.constant 0 : index
    %c0_140 = arith.constant 0 : index
    %180 = vector.load %arg7[%c1_137, %c0_138, %c0_139, %c0_140] : memref<2x2x1x8xf32, #tpu.memory_space<vmem>>, vector<1x1x1x8xf32>
    %181 = vector.shape_cast %180 : vector<1x1x1x8xf32> to vector<1x8xf32>
    %182 = vector.broadcast %181 : vector<1x8xf32> to vector<16x8xf32>
    %183 = arith.addf %179, %182 : vector<16x8xf32>
    %c1_141 = arith.constant 1 : index
    %c0_142 = arith.constant 0 : index
    %c0_143 = arith.constant 0 : index
    %c0_144 = arith.constant 0 : index
    %184 = vector.load %arg8[%c1_141, %c0_142, %c0_143, %c0_144] : memref<2x2x8x8xf32, #tpu.memory_space<vmem>>, vector<1x1x8x8xf32>
    %185 = vector.shape_cast %184 : vector<1x1x8x8xf32> to vector<8x8xf32>
    %cst_145 = arith.constant dense<0.000000e+00> : vector<16x8xf32>
    %186 = tpu.matmul %161, %185, %cst_145 {dimension_numbers = #tpu.dot_dimension_numbers<[1], [0], [0], [1], [0, 0, 1, 1], [], []>} : vector<16x8xf32>, vector<8x8xf32>, vector<16x8xf32> -> vector<16x8xf32>
    %c1_146 = arith.constant 1 : index
    %c0_147 = arith.constant 0 : index
    %c0_148 = arith.constant 0 : index
    %c0_149 = arith.constant 0 : index
    %187 = vector.load %arg9[%c1_146, %c0_147, %c0_148, %c0_149] : memref<2x2x1x8xf32, #tpu.memory_space<vmem>>, vector<1x1x1x8xf32>
    %188 = vector.shape_cast %187 : vector<1x1x1x8xf32> to vector<1x8xf32>
    %189 = vector.broadcast %188 : vector<1x8xf32> to vector<16x8xf32>
    %190 = arith.addf %186, %189 : vector<16x8xf32>
    %191 = tpu.transpose %183, [1, 0] : vector<16x8xf32> -> vector<8x16xf32>
    %cst_150 = arith.constant dense<0.000000e+00> : vector<16x16xf32>
    %192 = tpu.matmul %176, %191, %cst_150 {dimension_numbers = #tpu.dot_dimension_numbers<[1], [0], [0], [1], [0, 0, 1, 1], [], []>} : vector<16x8xf32>, vector<8x16xf32>, vector<16x16xf32> -> vector<16x16xf32>
    %cst_151 = arith.constant -1.000000e+09 : f32
    %193 = vector.broadcast %cst_151 : f32 to vector<16x16xf32>
    %194 = arith.select %3, %192, %193 : vector<16x16xi1>, vector<16x16xf32>
    %cst_152 = arith.constant dense<0xFF800000> : vector<16xf32>
    %195 = vector.multi_reduction <maximumf>, %194, %cst_152 [1] : vector<16x16xf32> to vector<16xf32>
    %196 = vector.shape_cast %195 : vector<16xf32> to vector<16x1xf32>
    %197 = vector.broadcast %196 : vector<16x1xf32> to vector<16x16xf32>
    %198 = arith.subf %194, %197 : vector<16x16xf32>
    %199 = math.exp %198 : vector<16x16xf32>
    %cst_153 = arith.constant dense<0.000000e+00> : vector<16xf32>
    %200 = vector.multi_reduction <add>, %199, %cst_153 [1] : vector<16x16xf32> to vector<16xf32>
    %201 = vector.shape_cast %200 : vector<16xf32> to vector<16x1xf32>
    %202 = tpu.reciprocal %201 {approx = true} : vector<16x1xf32> -> vector<16x1xf32>
    %203 = vector.broadcast %202 : vector<16x1xf32> to vector<16x16xf32>
    %204 = arith.mulf %199, %203 : vector<16x16xf32>
    %cst_154 = arith.constant dense<0.000000e+00> : vector<16x8xf32>
    %205 = tpu.matmul %204, %190, %cst_154 {dimension_numbers = #tpu.dot_dimension_numbers<[1], [0], [0], [1], [0, 0, 1, 1], [], []>} : vector<16x16xf32>, vector<16x8xf32>, vector<16x8xf32> -> vector<16x8xf32>
    %c1_155 = arith.constant 1 : index
    %c0_156 = arith.constant 0 : index
    %c0_157 = arith.constant 0 : index
    %c0_158 = arith.constant 0 : index
    %206 = vector.load %arg10[%c1_155, %c0_156, %c0_157, %c0_158] : memref<2x2x8x8xf32, #tpu.memory_space<vmem>>, vector<1x1x8x8xf32>
    %207 = vector.shape_cast %206 : vector<1x1x8x8xf32> to vector<8x8xf32>
    %cst_159 = arith.constant dense<0.000000e+00> : vector<16x8xf32>
    %208 = tpu.matmul %205, %207, %cst_159 {dimension_numbers = #tpu.dot_dimension_numbers<[1], [0], [0], [1], [0, 0, 1, 1], [], []>} : vector<16x8xf32>, vector<8x8xf32>, vector<16x8xf32> -> vector<16x8xf32>
    %c1_160 = arith.constant 1 : index
    %c1_161 = arith.constant 1 : index
    %c0_162 = arith.constant 0 : index
    %c0_163 = arith.constant 0 : index
    %209 = vector.load %arg4[%c1_160, %c1_161, %c0_162, %c0_163] : memref<2x2x16x8xf32, #tpu.memory_space<vmem>>, vector<1x1x16x8xf32>
    %210 = vector.shape_cast %209 : vector<1x1x16x8xf32> to vector<16x8xf32>
    %cst_164 = arith.constant dense<0.000000e+00> : vector<16x8xf32>
    %211 = tpu.matmul %169, %210, %cst_164 {dimension_numbers = #tpu.dot_dimension_numbers<[1], [0], [0], [1], [0, 0, 1, 1], [], []>} : vector<16x16xf32>, vector<16x8xf32>, vector<16x8xf32> -> vector<16x8xf32>
    %c1_165 = arith.constant 1 : index
    %c1_166 = arith.constant 1 : index
    %c0_167 = arith.constant 0 : index
    %c0_168 = arith.constant 0 : index
    %212 = vector.load %arg5[%c1_165, %c1_166, %c0_167, %c0_168] : memref<2x2x1x8xf32, #tpu.memory_space<vmem>>, vector<1x1x1x8xf32>
    %213 = vector.shape_cast %212 : vector<1x1x1x8xf32> to vector<1x8xf32>
    %214 = vector.broadcast %213 : vector<1x8xf32> to vector<16x8xf32>
    %215 = arith.addf %211, %214 : vector<16x8xf32>
    %c1_169 = arith.constant 1 : index
    %c1_170 = arith.constant 1 : index
    %c0_171 = arith.constant 0 : index
    %c0_172 = arith.constant 0 : index
    %216 = vector.load %arg6[%c1_169, %c1_170, %c0_171, %c0_172] : memref<2x2x16x8xf32, #tpu.memory_space<vmem>>, vector<1x1x16x8xf32>
    %217 = vector.shape_cast %216 : vector<1x1x16x8xf32> to vector<16x8xf32>
    %cst_173 = arith.constant dense<0.000000e+00> : vector<16x8xf32>
    %218 = tpu.matmul %169, %217, %cst_173 {dimension_numbers = #tpu.dot_dimension_numbers<[1], [0], [0], [1], [0, 0, 1, 1], [], []>} : vector<16x16xf32>, vector<16x8xf32>, vector<16x8xf32> -> vector<16x8xf32>
    %c1_174 = arith.constant 1 : index
    %c1_175 = arith.constant 1 : index
    %c0_176 = arith.constant 0 : index
    %c0_177 = arith.constant 0 : index
    %219 = vector.load %arg7[%c1_174, %c1_175, %c0_176, %c0_177] : memref<2x2x1x8xf32, #tpu.memory_space<vmem>>, vector<1x1x1x8xf32>
    %220 = vector.shape_cast %219 : vector<1x1x1x8xf32> to vector<1x8xf32>
    %221 = vector.broadcast %220 : vector<1x8xf32> to vector<16x8xf32>
    %222 = arith.addf %218, %221 : vector<16x8xf32>
    %c1_178 = arith.constant 1 : index
    %c1_179 = arith.constant 1 : index
    %c0_180 = arith.constant 0 : index
    %c0_181 = arith.constant 0 : index
    %223 = vector.load %arg8[%c1_178, %c1_179, %c0_180, %c0_181] : memref<2x2x8x8xf32, #tpu.memory_space<vmem>>, vector<1x1x8x8xf32>
    %224 = vector.shape_cast %223 : vector<1x1x8x8xf32> to vector<8x8xf32>
    %cst_182 = arith.constant dense<0.000000e+00> : vector<16x8xf32>
    %225 = tpu.matmul %161, %224, %cst_182 {dimension_numbers = #tpu.dot_dimension_numbers<[1], [0], [0], [1], [0, 0, 1, 1], [], []>} : vector<16x8xf32>, vector<8x8xf32>, vector<16x8xf32> -> vector<16x8xf32>
    %c1_183 = arith.constant 1 : index
    %c1_184 = arith.constant 1 : index
    %c0_185 = arith.constant 0 : index
    %c0_186 = arith.constant 0 : index
    %226 = vector.load %arg9[%c1_183, %c1_184, %c0_185, %c0_186] : memref<2x2x1x8xf32, #tpu.memory_space<vmem>>, vector<1x1x1x8xf32>
    %227 = vector.shape_cast %226 : vector<1x1x1x8xf32> to vector<1x8xf32>
    %228 = vector.broadcast %227 : vector<1x8xf32> to vector<16x8xf32>
    %229 = arith.addf %225, %228 : vector<16x8xf32>
    %230 = tpu.transpose %222, [1, 0] : vector<16x8xf32> -> vector<8x16xf32>
    %cst_187 = arith.constant dense<0.000000e+00> : vector<16x16xf32>
    %231 = tpu.matmul %215, %230, %cst_187 {dimension_numbers = #tpu.dot_dimension_numbers<[1], [0], [0], [1], [0, 0, 1, 1], [], []>} : vector<16x8xf32>, vector<8x16xf32>, vector<16x16xf32> -> vector<16x16xf32>
    %cst_188 = arith.constant -1.000000e+09 : f32
    %232 = vector.broadcast %cst_188 : f32 to vector<16x16xf32>
    %233 = arith.select %3, %231, %232 : vector<16x16xi1>, vector<16x16xf32>
    %cst_189 = arith.constant dense<0xFF800000> : vector<16xf32>
    %234 = vector.multi_reduction <maximumf>, %233, %cst_189 [1] : vector<16x16xf32> to vector<16xf32>
    %235 = vector.shape_cast %234 : vector<16xf32> to vector<16x1xf32>
    %236 = vector.broadcast %235 : vector<16x1xf32> to vector<16x16xf32>
    %237 = arith.subf %233, %236 : vector<16x16xf32>
    %238 = math.exp %237 : vector<16x16xf32>
    %cst_190 = arith.constant dense<0.000000e+00> : vector<16xf32>
    %239 = vector.multi_reduction <add>, %238, %cst_190 [1] : vector<16x16xf32> to vector<16xf32>
    %240 = vector.shape_cast %239 : vector<16xf32> to vector<16x1xf32>
    %241 = tpu.reciprocal %240 {approx = true} : vector<16x1xf32> -> vector<16x1xf32>
    %242 = vector.broadcast %241 : vector<16x1xf32> to vector<16x16xf32>
    %243 = arith.mulf %238, %242 : vector<16x16xf32>
    %cst_191 = arith.constant dense<0.000000e+00> : vector<16x8xf32>
    %244 = tpu.matmul %243, %229, %cst_191 {dimension_numbers = #tpu.dot_dimension_numbers<[1], [0], [0], [1], [0, 0, 1, 1], [], []>} : vector<16x16xf32>, vector<16x8xf32>, vector<16x8xf32> -> vector<16x8xf32>
    %c1_192 = arith.constant 1 : index
    %c1_193 = arith.constant 1 : index
    %c0_194 = arith.constant 0 : index
    %c0_195 = arith.constant 0 : index
    %245 = vector.load %arg10[%c1_192, %c1_193, %c0_194, %c0_195] : memref<2x2x8x8xf32, #tpu.memory_space<vmem>>, vector<1x1x8x8xf32>
    %246 = vector.shape_cast %245 : vector<1x1x8x8xf32> to vector<8x8xf32>
    %cst_196 = arith.constant dense<0.000000e+00> : vector<16x8xf32>
    %247 = tpu.matmul %244, %246, %cst_196 {dimension_numbers = #tpu.dot_dimension_numbers<[1], [0], [0], [1], [0, 0, 1, 1], [], []>} : vector<16x8xf32>, vector<8x8xf32>, vector<16x8xf32> -> vector<16x8xf32>
    %248 = arith.addf %208, %247 : vector<16x8xf32>
    %c1_197 = arith.constant 1 : index
    %c0_198 = arith.constant 0 : index
    %c0_199 = arith.constant 0 : index
    %249 = vector.load %arg11[%c1_197, %c0_198, %c0_199] : memref<2x1x8xf32, #tpu.memory_space<vmem>>, vector<1x1x8xf32>
    %250 = vector.shape_cast %249 : vector<1x1x8xf32> to vector<1x8xf32>
    %251 = vector.broadcast %250 : vector<1x8xf32> to vector<16x8xf32>
    %252 = arith.addf %248, %251 : vector<16x8xf32>
    %253 = arith.addf %161, %252 : vector<16x8xf32>
    %c1_200 = arith.constant 1 : index
    %c0_201 = arith.constant 0 : index
    %c0_202 = arith.constant 0 : index
    %254 = vector.load %arg12[%c1_200, %c0_201, %c0_202] : memref<2x1x8xf32, #tpu.memory_space<vmem>>, vector<1x1x8xf32>
    %255 = vector.shape_cast %254 : vector<1x1x8xf32> to vector<1x8xf32>
    %c1_203 = arith.constant 1 : index
    %c0_204 = arith.constant 0 : index
    %c0_205 = arith.constant 0 : index
    %256 = vector.load %arg13[%c1_203, %c0_204, %c0_205] : memref<2x1x8xf32, #tpu.memory_space<vmem>>, vector<1x1x8xf32>
    %257 = vector.shape_cast %256 : vector<1x1x8xf32> to vector<1x8xf32>
    %cst_206 = arith.constant dense<0.000000e+00> : vector<16xf32>
    %258 = vector.multi_reduction <add>, %253, %cst_206 [1] : vector<16x8xf32> to vector<16xf32>
    %259 = vector.shape_cast %258 : vector<16xf32> to vector<16x1xf32>
    %cst_207 = arith.constant 8.000000e+00 : f32
    %260 = vector.broadcast %cst_207 : f32 to vector<16x1xf32>
    %261 = arith.divf %259, %260 : vector<16x1xf32>
    %262 = vector.broadcast %261 : vector<16x1xf32> to vector<16x8xf32>
    %263 = arith.subf %253, %262 : vector<16x8xf32>
    %264 = arith.mulf %263, %263 : vector<16x8xf32>
    %cst_208 = arith.constant dense<0.000000e+00> : vector<16xf32>
    %265 = vector.multi_reduction <add>, %264, %cst_208 [1] : vector<16x8xf32> to vector<16xf32>
    %266 = vector.shape_cast %265 : vector<16xf32> to vector<16x1xf32>
    %cst_209 = arith.constant 8.000000e+00 : f32
    %267 = vector.broadcast %cst_209 : f32 to vector<16x1xf32>
    %268 = arith.divf %266, %267 : vector<16x1xf32>
    %cst_210 = arith.constant 9.99999974E-6 : f32
    %269 = vector.broadcast %cst_210 : f32 to vector<16x1xf32>
    %270 = arith.addf %268, %269 : vector<16x1xf32>
    %271 = math.rsqrt %270 : vector<16x1xf32>
    %272 = vector.broadcast %271 : vector<16x1xf32> to vector<16x8xf32>
    %273 = arith.mulf %263, %272 : vector<16x8xf32>
    %274 = vector.broadcast %255 : vector<1x8xf32> to vector<16x8xf32>
    %275 = arith.mulf %274, %273 : vector<16x8xf32>
    %276 = vector.broadcast %257 : vector<1x8xf32> to vector<16x8xf32>
    %277 = arith.addf %275, %276 : vector<16x8xf32>
    %c1_211 = arith.constant 1 : index
    %c0_212 = arith.constant 0 : index
    %c0_213 = arith.constant 0 : index
    %278 = vector.load %arg14[%c1_211, %c0_212, %c0_213] : memref<2x8x32xf32, #tpu.memory_space<vmem>>, vector<1x8x32xf32>
    %279 = vector.shape_cast %278 : vector<1x8x32xf32> to vector<8x32xf32>
    %cst_214 = arith.constant dense<0.000000e+00> : vector<16x32xf32>
    %280 = tpu.matmul %277, %279, %cst_214 {dimension_numbers = #tpu.dot_dimension_numbers<[1], [0], [0], [1], [0, 0, 1, 1], [], []>} : vector<16x8xf32>, vector<8x32xf32>, vector<16x32xf32> -> vector<16x32xf32>
    %c1_215 = arith.constant 1 : index
    %c0_216 = arith.constant 0 : index
    %c0_217 = arith.constant 0 : index
    %281 = vector.load %arg15[%c1_215, %c0_216, %c0_217] : memref<2x1x32xf32, #tpu.memory_space<vmem>>, vector<1x1x32xf32>
    %282 = vector.shape_cast %281 : vector<1x1x32xf32> to vector<1x32xf32>
    %283 = vector.broadcast %282 : vector<1x32xf32> to vector<16x32xf32>
    %284 = arith.addf %280, %283 : vector<16x32xf32>
    %cst_218 = arith.constant 0.000000e+00 : f32
    %285 = vector.broadcast %cst_218 : f32 to vector<16x32xf32>
    %286 = arith.maximumf %284, %285 : vector<16x32xf32>
    %c1_219 = arith.constant 1 : index
    %c0_220 = arith.constant 0 : index
    %c0_221 = arith.constant 0 : index
    %287 = vector.load %arg16[%c1_219, %c0_220, %c0_221] : memref<2x32x8xf32, #tpu.memory_space<vmem>>, vector<1x32x8xf32>
    %288 = vector.shape_cast %287 : vector<1x32x8xf32> to vector<32x8xf32>
    %cst_222 = arith.constant dense<0.000000e+00> : vector<16x8xf32>
    %289 = tpu.matmul %286, %288, %cst_222 {dimension_numbers = #tpu.dot_dimension_numbers<[1], [0], [0], [1], [0, 0, 1, 1], [], []>} : vector<16x32xf32>, vector<32x8xf32>, vector<16x8xf32> -> vector<16x8xf32>
    %c1_223 = arith.constant 1 : index
    %c0_224 = arith.constant 0 : index
    %c0_225 = arith.constant 0 : index
    %290 = vector.load %arg17[%c1_223, %c0_224, %c0_225] : memref<2x1x8xf32, #tpu.memory_space<vmem>>, vector<1x1x8xf32>
    %291 = vector.shape_cast %290 : vector<1x1x8xf32> to vector<1x8xf32>
    %292 = vector.broadcast %291 : vector<1x8xf32> to vector<16x8xf32>
    %293 = arith.addf %289, %292 : vector<16x8xf32>
    %294 = arith.addf %277, %293 : vector<16x8xf32>
    %c1_226 = arith.constant 1 : index
    %c0_227 = arith.constant 0 : index
    %c0_228 = arith.constant 0 : index
    %295 = vector.load %arg18[%c1_226, %c0_227, %c0_228] : memref<2x1x8xf32, #tpu.memory_space<vmem>>, vector<1x1x8xf32>
    %296 = vector.shape_cast %295 : vector<1x1x8xf32> to vector<1x8xf32>
    %c1_229 = arith.constant 1 : index
    %c0_230 = arith.constant 0 : index
    %c0_231 = arith.constant 0 : index
    %297 = vector.load %arg19[%c1_229, %c0_230, %c0_231] : memref<2x1x8xf32, #tpu.memory_space<vmem>>, vector<1x1x8xf32>
    %298 = vector.shape_cast %297 : vector<1x1x8xf32> to vector<1x8xf32>
    %cst_232 = arith.constant dense<0.000000e+00> : vector<16xf32>
    %299 = vector.multi_reduction <add>, %294, %cst_232 [1] : vector<16x8xf32> to vector<16xf32>
    %300 = vector.shape_cast %299 : vector<16xf32> to vector<16x1xf32>
    %cst_233 = arith.constant 8.000000e+00 : f32
    %301 = vector.broadcast %cst_233 : f32 to vector<16x1xf32>
    %302 = arith.divf %300, %301 : vector<16x1xf32>
    %303 = vector.broadcast %302 : vector<16x1xf32> to vector<16x8xf32>
    %304 = arith.subf %294, %303 : vector<16x8xf32>
    %305 = arith.mulf %304, %304 : vector<16x8xf32>
    %cst_234 = arith.constant dense<0.000000e+00> : vector<16xf32>
    %306 = vector.multi_reduction <add>, %305, %cst_234 [1] : vector<16x8xf32> to vector<16xf32>
    %307 = vector.shape_cast %306 : vector<16xf32> to vector<16x1xf32>
    %cst_235 = arith.constant 8.000000e+00 : f32
    %308 = vector.broadcast %cst_235 : f32 to vector<16x1xf32>
    %309 = arith.divf %307, %308 : vector<16x1xf32>
    %cst_236 = arith.constant 9.99999974E-6 : f32
    %310 = vector.broadcast %cst_236 : f32 to vector<16x1xf32>
    %311 = arith.addf %309, %310 : vector<16x1xf32>
    %312 = math.rsqrt %311 : vector<16x1xf32>
    %313 = vector.broadcast %312 : vector<16x1xf32> to vector<16x8xf32>
    %314 = arith.mulf %304, %313 : vector<16x8xf32>
    %315 = vector.broadcast %296 : vector<1x8xf32> to vector<16x8xf32>
    %316 = arith.mulf %315, %314 : vector<16x8xf32>
    %317 = vector.broadcast %298 : vector<1x8xf32> to vector<16x8xf32>
    %318 = arith.addf %316, %317 : vector<16x8xf32>
    %c0_237 = arith.constant 0 : index
    %c0_238 = arith.constant 0 : index
    %319 = vector.load %arg20[%c0_237, %c0_238] : memref<16x8xf32, #tpu.memory_space<vmem>>, vector<16x8xf32>
    tpu.vector_store %arg20[%c0_237, %c0_238], %318 {strides = array<i32>} : memref<16x8xf32, #tpu.memory_space<vmem>>, vector<16x8xf32>,
    return
  }
  func.func @transform_0(%arg0: i32) -> (i32, i32) {
    %c0_i32 = arith.constant 0 : i32
    %c0_i32_0 = arith.constant 0 : i32
    return %arg0, %c0_i32 : i32, i32
  }
  func.func @transform_1(%arg0: i32) -> (i32, i32) {
    %c0_i32 = arith.constant 0 : i32
    %c0_i32_0 = arith.constant 0 : i32
    %c0_i32_1 = arith.constant 0 : i32
    return %c0_i32, %c0_i32_0 : i32, i32
  }
  func.func @transform_2(%arg0: i32) -> (i32, i32) {
    %c0_i32 = arith.constant 0 : i32
    %c0_i32_0 = arith.constant 0 : i32
    %c0_i32_1 = arith.constant 0 : i32
    return %c0_i32, %c0_i32_0 : i32, i32
  }
  func.func @transform_3(%arg0: i32) -> (i32, i32, i32, i32) {
    %c0_i32 = arith.constant 0 : i32
    %c0_i32_0 = arith.constant 0 : i32
    %c0_i32_1 = arith.constant 0 : i32
    %c0_i32_2 = arith.constant 0 : i32
    %c0_i32_3 = arith.constant 0 : i32
    return %c0_i32, %c0_i32_0, %c0_i32_1, %c0_i32_2 : i32, i32, i32, i32
  }
  func.func @transform_4(%arg0: i32) -> (i32, i32, i32, i32) {
    %c0_i32 = arith.constant 0 : i32
    %c0_i32_0 = arith.constant 0 : i32
    %c0_i32_1 = arith.constant 0 : i32
    %c0_i32_2 = arith.constant 0 : i32
    %c0_i32_3 = arith.constant 0 : i32
    return %c0_i32, %c0_i32_0, %c0_i32_1, %c0_i32_2 : i32, i32, i32, i32
  }
  func.func @transform_5(%arg0: i32) -> (i32, i32, i32, i32) {
    %c0_i32 = arith.constant 0 : i32
    %c0_i32_0 = arith.constant 0 : i32
    %c0_i32_1 = arith.constant 0 : i32
    %c0_i32_2 = arith.constant 0 : i32
    %c0_i32_3 = arith.constant 0 : i32
    return %c0_i32, %c0_i32_0, %c0_i32_1, %c0_i32_2 : i32, i32, i32, i32
  }
  func.func @transform_6(%arg0: i32) -> (i32, i32, i32, i32) {
    %c0_i32 = arith.constant 0 : i32
    %c0_i32_0 = arith.constant 0 : i32
    %c0_i32_1 = arith.constant 0 : i32
    %c0_i32_2 = arith.constant 0 : i32
    %c0_i32_3 = arith.constant 0 : i32
    return %c0_i32, %c0_i32_0, %c0_i32_1, %c0_i32_2 : i32, i32, i32, i32
  }
  func.func @transform_7(%arg0: i32) -> (i32, i32, i32, i32) {
    %c0_i32 = arith.constant 0 : i32
    %c0_i32_0 = arith.constant 0 : i32
    %c0_i32_1 = arith.constant 0 : i32
    %c0_i32_2 = arith.constant 0 : i32
    %c0_i32_3 = arith.constant 0 : i32
    return %c0_i32, %c0_i32_0, %c0_i32_1, %c0_i32_2 : i32, i32, i32, i32
  }
  func.func @transform_8(%arg0: i32) -> (i32, i32, i32, i32) {
    %c0_i32 = arith.constant 0 : i32
    %c0_i32_0 = arith.constant 0 : i32
    %c0_i32_1 = arith.constant 0 : i32
    %c0_i32_2 = arith.constant 0 : i32
    %c0_i32_3 = arith.constant 0 : i32
    return %c0_i32, %c0_i32_0, %c0_i32_1, %c0_i32_2 : i32, i32, i32, i32
  }
  func.func @transform_9(%arg0: i32) -> (i32, i32, i32, i32) {
    %c0_i32 = arith.constant 0 : i32
    %c0_i32_0 = arith.constant 0 : i32
    %c0_i32_1 = arith.constant 0 : i32
    %c0_i32_2 = arith.constant 0 : i32
    %c0_i32_3 = arith.constant 0 : i32
    return %c0_i32, %c0_i32_0, %c0_i32_1, %c0_i32_2 : i32, i32, i32, i32
  }
  func.func @transform_10(%arg0: i32) -> (i32, i32, i32) {
    %c0_i32 = arith.constant 0 : i32
    %c0_i32_0 = arith.constant 0 : i32
    %c0_i32_1 = arith.constant 0 : i32
    %c0_i32_2 = arith.constant 0 : i32
    return %c0_i32, %c0_i32_0, %c0_i32_1 : i32, i32, i32
  }
  func.func @transform_11(%arg0: i32) -> (i32, i32, i32) {
    %c0_i32 = arith.constant 0 : i32
    %c0_i32_0 = arith.constant 0 : i32
    %c0_i32_1 = arith.constant 0 : i32
    %c0_i32_2 = arith.constant 0 : i32
    return %c0_i32, %c0_i32_0, %c0_i32_1 : i32, i32, i32
  }
  func.func @transform_12(%arg0: i32) -> (i32, i32, i32) {
    %c0_i32 = arith.constant 0 : i32
    %c0_i32_0 = arith.constant 0 : i32
    %c0_i32_1 = arith.constant 0 : i32
    %c0_i32_2 = arith.constant 0 : i32
    return %c0_i32, %c0_i32_0, %c0_i32_1 : i32, i32, i32
  }
  func.func @transform_13(%arg0: i32) -> (i32, i32, i32) {
    %c0_i32 = arith.constant 0 : i32
    %c0_i32_0 = arith.constant 0 : i32
    %c0_i32_1 = arith.constant 0 : i32
    %c0_i32_2 = arith.constant 0 : i32
    return %c0_i32, %c0_i32_0, %c0_i32_1 : i32, i32, i32
  }
  func.func @transform_14(%arg0: i32) -> (i32, i32, i32) {
    %c0_i32 = arith.constant 0 : i32
    %c0_i32_0 = arith.constant 0 : i32
    %c0_i32_1 = arith.constant 0 : i32
    %c0_i32_2 = arith.constant 0 : i32
    return %c0_i32, %c0_i32_0, %c0_i32_1 : i32, i32, i32
  }
  func.func @transform_15(%arg0: i32) -> (i32, i32, i32) {
    %c0_i32 = arith.constant 0 : i32
    %c0_i32_0 = arith.constant 0 : i32
    %c0_i32_1 = arith.constant 0 : i32
    %c0_i32_2 = arith.constant 0 : i32
    return %c0_i32, %c0_i32_0, %c0_i32_1 : i32, i32, i32
  }
  func.func @transform_16(%arg0: i32) -> (i32, i32, i32) {
    %c0_i32 = arith.constant 0 : i32
    %c0_i32_0 = arith.constant 0 : i32
    %c0_i32_1 = arith.constant 0 : i32
    %c0_i32_2 = arith.constant 0 : i32
    return %c0_i32, %c0_i32_0, %c0_i32_1 : i32, i32, i32
  }
  func.func @transform_17(%arg0: i32) -> (i32, i32, i32) {
    %c0_i32 = arith.constant 0 : i32
    %c0_i32_0 = arith.constant 0 : i32
    %c0_i32_1 = arith.constant 0 : i32
    %c0_i32_2 = arith.constant 0 : i32
    return %c0_i32, %c0_i32_0, %c0_i32_1 : i32, i32, i32
  }
  func.func @transform_18(%arg0: i32) -> (i32, i32, i32) {
    %c0_i32 = arith.constant 0 : i32
    %c0_i32_0 = arith.constant 0 : i32
    %c0_i32_1 = arith.constant 0 : i32
    %c0_i32_2 = arith.constant 0 : i32
    return %c0_i32, %c0_i32_0, %c0_i32_1 : i32, i32, i32
  }
  func.func @transform_19(%arg0: i32) -> (i32, i32) {
    %c0_i32 = arith.constant 0 : i32
    %c0_i32_0 = arith.constant 0 : i32
    return %arg0, %c0_i32 : i32, i32
  }
}

</mosaic_0001>

<bundles_post_ra>
// kernel: tpu_custom_call.1
= control target key start
LH: loop header
LB: loop body
LE: loop exit
PB: predicated region body
PF: predicated region fallthrough
CT: control target
= control target key end

     0   :  { %v3407_v0 = vmov 0   ;;  %s3408_s24 = smov 8   ;;  %vm99_vm2 = vcmask 64512   ;;  %v72_v13 = vlaneseq  ;;  %vm111_vm5 = vcmask 130048   ;;  %s3938_s2 = inlined_call_operand.vmem [shape: s32[16,1], index: 2, kind: input, shape index: {}]   ;;  %s3939_s0 = inlined_call_operand.vmem [shape: f32[16,8], index: 0, kind: input, shape index: {}]   ;;  %s3940_s3 = inlined_call_operand.vmem [shape: f32[2,2,16,8], index: 3, kind: input, shape index: {}]   ;;  %s3941_s5 = inlined_call_operand.vmem [shape: f32[2,2,16,8], index: 5, kind: input, shape index: {}]   ;;  %s3942_s4 = inlined_call_operand.vmem [shape: f32[2,2,1,8], index: 4, kind: input, shape index: {}]   ;;  %s3943_s6 = inlined_call_operand.vmem [shape: f32[2,2,1,8], index: 6, kind: input, shape index: {}]   ;;  %s3944_s7 = inlined_call_operand.vmem [shape: f32[2,2,8,8], index: 7, kind: input, shape index: {}]   ;;  %s3945_s1 = inlined_call_operand.vmem [shape: f32[16,16], index: 1, kind: input, shape index: {}]   ;;  %s3946_s8 = inlined_call_operand.vmem [shape: f32[2,2,1,8], index: 8, kind: input, shape index: {}]   ;;  %s3947_s9 = inlined_call_operand.vmem [shape: f32[2,2,8,8], index: 9, kind: input, shape index: {}]   ;;  %s3948_s10 = inlined_call_operand.vmem [shape: f32[2,1,8], index: 10, kind: input, shape index: {}]   ;;  %s3949_s13 = inlined_call_operand.vmem [shape: f32[2,8,32], index: 13, kind: input, shape index: {}]   ;;  %s3950_s15 = inlined_call_operand.vmem [shape: f32[2,32,8], index: 15, kind: input, shape index: {}]   ;;  %s3951_s11 = inlined_call_operand.vmem [shape: f32[2,1,8], index: 11, kind: input, shape index: {}]   ;;  %s3952_s12 = inlined_call_operand.vmem [shape: f32[2,1,8], index: 12, kind: input, shape index: {}]   ;;  %s3953_s14 = inlined_call_operand.vmem [shape: f32[2,1,32], index: 14, kind: input, shape index: {}]   ;;  %s3954_s16 = inlined_call_operand.vmem [shape: f32[2,1,8], index: 16, kind: input, shape index: {}]   ;;  %s3955_s17 = inlined_call_operand.vmem [shape: f32[2,1,8], index: 17, kind: input, shape index: {}]   ;;  %s3956_s18 = inlined_call_operand.vmem [shape: f32[2,1,8], index: 18, kind: input, shape index: {}]   ;;  %s3957_s19 = inlined_call_operand.vmem [shape: f32[16,8], index: 19, kind: output, shape index: {}]  }
   0x1   :  { %3962 = sst [smem:[#allocation2_spill]] %s3938_s2  ;;  %3358 = vset.pattern.permute.xlu0 %v3407_v0  ;;  %v2845_v27 = vld [vmem:[%s3942_s4] ss:$0 sm:$0xff]  ;;  %vm3591_vm7 = vmpackc.low %vm99_vm2, %vm99_vm2  ;;  %v3612_v43 = vld [vmem:[%s3945_s1 + $0x8] sm:$0xff]  ;;  %vm1328_vm10 = vcmask 261120  }
   0x2   :  { %3963 = sst [smem:[#allocation3_spill]] %s3939_s0  ;;  %s3966_s20 = sld [smem:[#allocation2_spill]]  ;;  %v3543_v14 = vshrl.u32 %v72_v13, 7  ;;  %v2848_v31 = vld [vmem:[%s3943_s6] ss:$0 sm:$0xff]  ;;  %vm67_vm8 = vcmp.ne.f32.partialorder %v3612_v43, 0.0 }
   0x3   :  { %3964 = sst [smem:[#allocation4_spill]] %s3940_s3  ;;  %s3967_s23 = sld [smem:[#allocation3_spill]]  ;;  %v277_v42 = vld [vmem:[%s3944_s7] sm:$0xff] }
   0x4   :  { %3965 = sst [smem:[#allocation5_spill]] %s3941_s5  ;;  %s3968_s28 = sld [smem:[#allocation4_spill]]  ;;  %vm74_vm3 = vcmp.lt.s32.totalorder %v3543_v14, 1  ;;  %3094 = vmatprep.subr.mxu0 %v277_v42  ;;  %v3617_v44 = vld [vmem:[%s3945_s1] sm:$0xff] }
   0x5   :  { %s3969_s21 = sld [smem:[#allocation5_spill]]  ;;  %3095 = vmatpush3.msra.mxu0 %v277_v42  ;;  %vm66_vm9 = vcmp.ne.f32.partialorder %v3617_v44, 0.0  ;;  %v2869_v50 = vld [vmem:[%s3943_s6 + $0x1] ss:$0 sm:$0xff]  ;;  %v2913_v14 = vld [vmem:[%s3946_s8 + $0x2] ss:$0 sm:$0xff] }
   0x8   :  { %v68_v1 = vld [vmem:[%s3966_s20] sm:$0xff]  ;;  %v69_v2 = vld [vmem:[%s3966_s20 + $0x8] sm:$0xff] }
   0x9   :  { %v3518_v3 = vld [vmem:[%s3967_s23] sm:$0xff]  ;;  %vm77_vm0 = vcmp.ge.s32.totalorder %v68_v1, 1  ;;  %vm78_vm1 = vcmp.ge.s32.totalorder %v69_v2, 1  ;;  %v3525_v5 = vld [vmem:[%s3967_s23 + $0x8] sm:$0xff] }
   0xa   :  { %93 = vrot.lane.b32.xlu1 %v3518_v3, %s3408_s24  ;;  %v79_v4 = vsel %vm77_vm0, 1, %v3407_v0  ;;  %v102_v6 = vld [vmem:[%s3968_s28] sm:$0xff]  ;;  %v103_v7 = vld [vmem:[%s3968_s28 + $0x8] sm:$0xff]  ;;  %v80_v8 = vsel %vm78_vm1, 1, %v3407_v0  ;;  %3096 = vmatprep.mubr.msk.f32.mxu0 %vm99_vm2, %v3518_v3  ;;  %v70_v15 = vrot.slane %v3518_v3, 7  ;;  %v71_v16 = vrot.slane %v3525_v5, 7 }
   0xb   :  { %82 = vperm.xlu0 %3358, %v79_v4   ;;  %v3264_v9 = vpack.c.bf16 %v103_v7, %v102_v6  ;;  %v193_v10 = vld [vmem:[%s3969_s21] sm:$0xff]  ;;  %v194_v11 = vld [vmem:[%s3969_s21 + $0x8] sm:$0xff]  ;;  %v2866_v35 = vld [vmem:[%s3969_s21 + $0x10] sm:$0xff]  ;;  %3097 = vmatmul.mubr.msk.f32.vlgmr.msra.gmra.mrb[0].mxu0 %vm99_vm2, %v3525_v5 }
   0xc   :  { %v3268_v12 = vpack.c.bf16 %v194_v11, %v193_v10  ;;  %v76_v18 = vsel %vm74_vm3, %v71_v16, %v70_v15  ;;  %v75_v22 = vsel %vm74_vm3, %v70_v15, %v71_v16  ;;  %v2867_v36 = vld [vmem:[%s3969_s21 + $0x18] sm:$0xff]  ;;  %v2851_v6 = vld [vmem:[%s3946_s8] ss:$0 sm:$0xff]  ;;  %v2860_v11 = vld [vmem:[%s3968_s28 + $0x10] sm:$0xff] }
   0xd   :  { %3265 = vmatprep.subr.bf16.mxu1 %v3264_v9  ;;  %v3286_v40 = vpack.c.bf16 %v2867_v36, %v2866_v35  ;;  %v2923_v38 = vld [vmem:[%s3968_s28 + $0x30] sm:$0xff] }
   0xe   :  { %95 = vrot.lane.b32.xlu1 %v3525_v5, %s3408_s24  ;;  %3267 = vmatpush3.bf16.msra.mxu1 %v3264_v9 }
   0xf   :  { %85 = vperm.xlu0 %3358, %v80_v8   ;;  %3269 = vmatprep.subr.bf16.mxu1 %v3268_v12 }
  0x7c   :  { %v94_v17 = vpop.permute.xlu1 %93 }
  0x80   :  { %v96_v24 = vpop.permute.xlu1 %95 }
  0x8a   :  { %v3550_v19 = vpop.permute.xlu0 %82 }
  0x8b   :  { %vm87_vm4 = vcmp.eq.s32.totalorder %v3550_v19, 1 }
  0x8c   :  { %v89_v20 = vsel %vm87_vm4, %v76_v18, 0.0 }
  0x8d   :  { %v3556_v21 = vsel %vm99_vm2, %v89_v20, %v94_v17 }
  0x8e   :  { %v3560_v23 = vpop.permute.xlu0 %85  ;;  %3084 = vmatprep.mubr.msk.f32.mxu1 %vm111_vm5, %v3556_v21 }
  0x8f   :  { %vm88_vm6 = vcmp.eq.s32.totalorder %v3560_v23, 1 }
  0x90   :  { %v90_v25 = vsel %vm88_vm6, %v75_v22, 0.0 }
  0x91   :  { %v3568_v26 = vsel %vm99_vm2, %v90_v25, %v96_v24 }
  0x92   :  { %3085 = vmatmul.mubr.msk.f32.vlgmr.msra.gmra.mrb[0].mxu1 %vm111_vm5, %v3568_v26 }
  0x93   :  { %3271 = vmatpush3.bf16.msra.mxu1 %v3268_v12  ;;  %3091 = vmatprep.mubr.msk.f32.mxu1 %vm111_vm5, %v3556_v21  ;;  %v2861_v12 = vld [vmem:[%s3968_s28 + $0x18] sm:$0xff] }
  0x94   :  { %v3282_v13 = vpack.c.bf16 %v2861_v12, %v2860_v11 }
  0x96   :  { %3092 = vmatmul.mubr.msk.f32.vlgmr.msra.gmra.mrb[2].mxu1 %vm111_vm5, %v3568_v26 }
  0xde   :  { %v3098_v4 = vpop.f32.mrb[0].mxu0 }
  0xdf   :  { %v355_v7 = vpop.f32.mrb[1].mxu0  ;;  %v361_v8 = vadd.f32 %v3098_v4, %v2851_v6 }
  0xe0   :  { %v356_v9 = vadd.f32 %v2851_v6, %v355_v7 }
  0xe2   :  { %v3278_v10 = vpack.c.bf16 %v361_v8, %v356_v9 }
  0xe4   :  { %3279 = vmatprep.subr.bf16.mxu0 %v3278_v10 }
  0xe5   :  { %3281 = vmatpush3.bf16.msra.mxu0 %v3278_v10 }
  0xe6   :  { %3283 = vmatprep.subr.bf16.mxu0 %v3282_v13 }
 0x165   :  { %v3086_v28 = vpop.f32.mrb[0].mxu1 }
 0x166   :  { %v184_v29 = vpop.f32.mrb[1].mxu1  ;;  %v190_v41 = vadd.f32 %v3086_v28, %v2845_v27 }
 0x167   :  { %v185_v30 = vadd.f32 %v2845_v27, %v184_v29  ;;  %v2863_v27 = vld [vmem:[%s3942_s4 + $0x1] ss:$0 sm:$0xff] }
 0x169   :  { %v3093_v32 = vpop.f32.mrb[2].mxu1  ;;  %3103 = vmatprep.mubr.msk.f32.mxu1 %vm99_vm2, %v185_v30 }
 0x16a   :  { %v274_v33 = vadd.f32 %v3093_v32, %v2848_v31  ;;  %v268_v34 = vpop.f32.mrb[3].mxu1 }
 0x16b   :  { %v269_v37 = vadd.f32 %v2848_v31, %v268_v34 }
 0x16d   :  { %v3272_v39 = vpack.c.bf16 %v274_v33, %v269_v37 }
 0x16f   :  { %3274 = vmatprep.subr.msk.bf16.mxu1 %vm3591_vm7, %v3272_v39 }
 0x170   :  { %3277 = vmatpush3.bf16.xpose.msk.msra.mxu1 %vm3591_vm7, %v3272_v39 }
 0x171   :  { %3287 = vmatprep.subr.bf16.mxu1 %v3286_v40 }
 0x177   :  { %3104 = vmatmul.mubr.msk.f32.vlgmr.msra.gmra.mrb[4].mxu1 %vm99_vm2, %v190_v41 }
 0x178   :  { %3289 = vmatpush3.bf16.msra.mxu1 %v3286_v40  ;;  %3124 = vmatprep.mubr.msk.f32.mxu1 %vm111_vm5, %v3556_v21 }
 0x17b   :  { %3125 = vmatmul.mubr.msk.f32.vlgmr.msra.gmra.mrb[6].mxu1 %vm111_vm5, %v3568_v26 }
 0x24a   :  { %v3105_v45 = vpop.f32.mrb[4].mxu1 }
 0x24b   :  { %v452_v46 = vsel %vm67_vm8, %v3105_v45, -1e+09  ;;  %v442_v47 = vpop.f32.mrb[5].mxu1 }
 0x24c   :  { %v451_v48 = vsel %vm66_vm9, %v442_v47, -1e+09  ;;  %v456_v49 = vsel %vm111_vm5, %v452_v46, -inf }
 0x24d   :  { %457 = vmax.xlane.f32.xlu1 %v456_v49  ;;  %v453_v51 = vsel %vm111_vm5, %v451_v48, -inf }
 0x24e   :  { %v3126_v52 = vpop.f32.mrb[6].mxu1  ;;  %454 = vmax.xlane.f32.xlu0 %v453_v51  ;;  %v2874_v51 = vld [vmem:[%s3946_s8 + $0x1] ss:$0 sm:$0xff] }
 0x24f   :  { %v726_v53 = vadd.f32 %v3126_v52, %v2869_v50  ;;  %v720_v54 = vpop.f32.mrb[7].mxu1 }
 0x250   :  { %v721_v55 = vadd.f32 %v2869_v50, %v720_v54 }
 0x252   :  { %v3290_v56 = vpack.c.bf16 %v726_v53, %v721_v55 }
 0x254   :  { %3292 = vmatprep.subr.msk.bf16.mxu1 %vm3591_vm7, %v3290_v56 }
 0x255   :  { %3295 = vmatpush3.bf16.xpose.msk.msra.mxu1 %vm3591_vm7, %v3290_v56  ;;  %v2883_v56 = vld [vmem:[%s3947_s9 + $0x8] sm:$0xff] }
 0x2da   :  { %v458_v57 = vpop.xlane.xlu1 %457 }
 0x2db   :  { %v460_v58 = vsub.f32 %v452_v46, %v458_v57  ;;  %v455_v59 = vpop.xlane.xlu0 %454 }
 0x2dc   :  { %v459_v60 = vsub.f32 %v451_v48, %v455_v59 }
 0x2dd   :  { %v463_v61 = vmul.f32 1.442695, %v460_v58 }
 0x2de   :  { %v461_v62 = vmul.f32 1.442695, %v459_v60 }
 0x2e0   :  { %3359 = vpow2.f32 %v461_v62 }
 0x2e1   :  { %3361 = vpow2.f32 %v463_v61 }
 0x2ea   :  { %v3360_v63 = vpop.eup %3359 }
 0x2eb   :  { %v465_v0 = vsel %vm111_vm5, %v3360_v63, 0.0  ;;  %v3362_v1 = vpop.eup %3361 }
 0x2ec   :  { %466 = vadd.xlane.f32.xlu0 %v465_v0  ;;  %v468_v2 = vsel %vm111_vm5, %v3362_v1, 0.0 }
 0x2f0   :  { %469 = vadd.xlane.f32.xlu0 %v468_v2  ;;  %v2888_v2 = vld [vmem:[%s3948_s10] ss:$0 sm:$0xff] }
 0x379   :  { %v467_v15 = vpop.xlane.xlu0 %466 }
 0x37a   :  { %3363 = vrcp.f32 %v467_v15 }
 0x37d   :  { %v470_v16 = vpop.xlane.xlu0 %469 }
 0x37e   :  { %3365 = vrcp.f32 %v470_v16 }
 0x384   :  { %v3364_v17 = vpop.eup %3363 }
 0x385   :  { %v473_v18 = vmul.f32 %v3364_v17, %v3360_v63  ;;  %v556_v63 = vld [vmem:[%s3947_s9] sm:$0xff] }
 0x387   :  { %3110 = vmatprep.mubr.msk.f32.mxu0 %vm111_vm5, %v473_v18 }
 0x388   :  { %v3366_v20 = vpop.eup %3365 }
 0x389   :  { %v474_v22 = vmul.f32 %v3366_v20, %v3362_v1 }
 0x38b   :  { %3111 = vmatmul.mubr.msk.f32.vlgmr.msra.gmra.mrb[2].mxu0 %vm111_vm5, %v474_v22 }
 0x38c   :  { %3285 = vmatpush3.bf16.msra.mxu0 %v3282_v13  ;;  %3117 = vmatprep.mubr.msk.f32.mxu0 %vm111_vm5, %v3556_v21  ;;  %v2872_v21 = vld [vmem:[%s3944_s7 + $0x8] sm:$0xff] }
 0x38d   :  { %3127 = vmatprep.subr.mxu0 %v2872_v21 }
 0x38f   :  { %3118 = vmatmul.mubr.msk.f32.vlgmr.msra.gmra.mrb[4].mxu0 %vm111_vm5, %v3568_v26 }
 0x390   :  { %3129 = vmatprep.mubr.msk.f32.mxu0 %vm99_vm2, %v3518_v3  ;;  %3128 = vmatpush3.msra.mxu0 %v2872_v21 }
 0x393   :  { %3130 = vmatmul.mubr.msk.f32.vlgmr.msra.gmra.mrb[6].mxu0 %vm99_vm2, %v3525_v5 }
 0x45e   :  { %v3653_v24 = vpop.f32.mrb[2].mxu0 }
 0x45f   :  { %v3655_v25 = vpop.f32.mrb[3].mxu0 }
 0x462   :  { %v3119_v28 = vpop.f32.mrb[4].mxu0 }
 0x463   :  { %v634_v29 = vpop.f32.mrb[5].mxu0  ;;  %v640_v31 = vadd.f32 %v3119_v28, %v2863_v27  ;;  %v1318_v28 = vld [vmem:[%s3950_s15 + $0x8] sm:$0xff] }
 0x464   :  { %v635_v30 = vadd.f32 %v2863_v27, %v634_v29  ;;  %v1317_v27 = vld [vmem:[%s3950_s15] sm:$0xff] }
 0x465   :  { %v3300_v29 = vpack.c.bf16 %v1318_v28, %v1317_v27  ;;  %v2905_v27 = vld [vmem:[%s3969_s21 + $0x20] sm:$0xff]  ;;  %v2906_v28 = vld [vmem:[%s3969_s21 + $0x28] sm:$0xff] }
 0x466   :  { %3136 = vmatprep.mubr.msk.f32.mxu1 %vm99_vm2, %v635_v30  ;;  %v3131_v50 = vpop.f32.mrb[6].mxu0 }
 0x467   :  { %3137 = vmatmul.mubr.msk.f32.vlgmr.msra.gmra.mrb[8].mxu1 %vm99_vm2, %v640_v31  ;;  %v805_v52 = vpop.f32.mrb[7].mxu0  ;;  %v811_v53 = vadd.f32 %v3131_v50, %v2874_v51  ;;  %v2891_v50 = vld [vmem:[%s3953_s14] ss:$0 sm:$0xff] }
 0x468   :  { %v806_v54 = vadd.f32 %v2874_v51, %v805_v52 }
 0x46a   :  { %v3296_v55 = vpack.c.bf16 %v811_v53, %v806_v54 }
 0x46c   :  { %3297 = vmatprep.subr.bf16.mxu0 %v3296_v55 }
 0x46d   :  { %3299 = vmatpush3.bf16.msra.mxu0 %v3296_v55 }
 0x46e   :  { %3146 = vmatprep.subr.mxu0 %v2883_v56 }
 0x53a   :  { %v3138_v26 = vpop.f32.mrb[8].mxu1 }
 0x53b   :  { %v902_v32 = vsel %vm67_vm8, %v3138_v26, -1e+09  ;;  %v892_v33 = vpop.f32.mrb[9].mxu1 }
 0x53c   :  { %v901_v34 = vsel %vm66_vm9, %v892_v33, -1e+09  ;;  %v906_v35 = vsel %vm111_vm5, %v902_v32, -inf }
 0x53d   :  { %907 = vmax.xlane.f32.xlu0 %v906_v35  ;;  %v903_v36 = vsel %vm111_vm5, %v901_v34, -inf  ;;  %v2889_v35 = vld [vmem:[%s3951_s11] ss:$0 sm:$0xff] }
 0x53e   :  { %904 = vmax.xlane.f32.xlu1 %v903_v36 }
 0x5ca   :  { %v908_v37 = vpop.xlane.xlu0 %907 }
 0x5cb   :  { %v910_v39 = vsub.f32 %v902_v32, %v908_v37  ;;  %v905_v40 = vpop.xlane.xlu1 %904 }
 0x5cc   :  { %v909_v41 = vsub.f32 %v901_v34, %v905_v40  ;;  %v2890_v40 = vld [vmem:[%s3952_s12] ss:$0 sm:$0xff] }
 0x5cd   :  { %v913_v42 = vmul.f32 1.442695, %v910_v39 }
 0x5ce   :  { %v911_v45 = vmul.f32 1.442695, %v909_v41 }
 0x5cf   :  { %3367 = vpow2.f32 %v913_v42 }
 0x5d0   :  { %3369 = vpow2.f32 %v911_v45 }
 0x5d9   :  { %v3368_v46 = vpop.eup %3367 }
 0x5da   :  { %v3370_v47 = vpop.eup %3369  ;;  %v918_v48 = vsel %vm111_vm5, %v3368_v46, 0.0 }
 0x5db   :  { %919 = vadd.xlane.f32.xlu0 %v918_v48  ;;  %v915_v49 = vsel %vm111_vm5, %v3370_v47, 0.0  ;;  %v1320_v48 = vld [vmem:[%s3950_s15 + $0x18] sm:$0xff] }
 0x5dc   :  { %916 = vadd.xlane.f32.xlu1 %v915_v49 }
 0x668   :  { %v920_v57 = vpop.xlane.xlu0 %919 }
 0x669   :  { %3371 = vrcp.f32 %v920_v57  ;;  %v917_v58 = vpop.xlane.xlu1 %916  ;;  %v2894_v57 = vld [vmem:[%s3954_s16] ss:$0 sm:$0xff] }
 0x66a   :  { %3373 = vrcp.f32 %v917_v58 }
 0x673   :  { %v3372_v59 = vpop.eup %3371 }
 0x674   :  { %v3374_v60 = vpop.eup %3373  ;;  %v924_v62 = vmul.f32 %v3372_v59, %v3368_v46 }
 0x675   :  { %v923_v61 = vmul.f32 %v3374_v60, %v3370_v47  ;;  %v1319_v47 = vld [vmem:[%s3950_s15 + $0x10] sm:$0xff] }
 0x676   :  { %v3304_v49 = vpack.c.bf16 %v1320_v48, %v1319_v47 }
 0x677   :  { %3143 = vmatprep.mubr.msk.f32.mxu0 %vm111_vm5, %v923_v61 }
 0x678   :  { %3144 = vmatmul.mubr.msk.f32.vlgmr.msra.gmra.mrb[8].mxu0 %vm111_vm5, %v924_v62 }
 0x679   :  { %3147 = vmatpush3.msra.mxu0 %v2883_v56 }
 0x67a   :  { %3151 = vmatprep.subr.mxu0 %v556_v63 }
 0x74b   :  { %v3145_v0 = vpop.f32.mrb[8].mxu0 }
 0x74c   :  { %v997_v1 = vpop.f32.mrb[9].mxu0 }
 0x74d   :  { %3148 = vmatprep.mubr.msk.f32.mxu0 %vm99_vm2, %v997_v1 }
 0x74e   :  { %3149 = vmatmul.mubr.msk.f32.vlgmr.msra.gmra.mrb[10].mxu0 %vm99_vm2, %v3145_v0 }
 0x74f   :  { %3152 = vmatpush3.msra.mxu0 %v556_v63  ;;  %3153 = vmatprep.mubr.msk.f32.mxu0 %vm99_vm2, %v3655_v25 }
 0x756   :  { %3154 = vmatmul.mubr.msk.f32.vlgmr.msra.gmra.mrb[10].mxu0 %vm99_vm2, %v3653_v24 }
 0x829   :  { %v3155_v4 = vpop.f32.mrb[10].mxu0 }
 0x82a   :  { %v1178_v6 = vadd.f32 %v3155_v4, %v2888_v2  ;;  %v1161_v7 = vpop.f32.mrb[11].mxu0 }
 0x82b   :  { %v1177_v8 = vadd.f32 %v2888_v2, %v1161_v7 }
 0x82c   :  { %v1180_v9 = vadd.f32 %v1178_v6, %v3525_v5 }
 0x82d   :  { %v1179_v10 = vadd.f32 %v1177_v8, %v3518_v3  ;;  %v1226_v3 = vld [vmem:[%s3949_s13] sm:$0xff] }
 0x82e   :  { %v1186_v11 = vsel %vm99_vm2, %v1180_v9, 0.0  ;;  %3156 = vmatprep.subr.mxu1 %v1226_v3 }
 0x82f   :  { %1187 = vadd.xlane.f32.xlu0 %v1186_v11  ;;  %v1183_v12 = vsel %vm99_vm2, %v1179_v10, 0.0  ;;  %3157 = vmatpush3.msra.mxu1 %v1226_v3 }
 0x830   :  { %1184 = vadd.xlane.f32.xlu1 %v1183_v12  ;;  %3301 = vmatprep.subr.bf16.mxu1 %v3300_v29 }
 0x8bc   :  { %v1188_v13 = vpop.xlane.xlu0 %1187 }
 0x8bd   :  { %v1191_v15 = vmul.f32 0.125, %v1188_v13  ;;  %v1185_v16 = vpop.xlane.xlu1 %1184 }
 0x8be   :  { %v1190_v17 = vmul.f32 0.125, %v1185_v16  ;;  %v2899_v16 = vld [vmem:[%s3968_s28 + $0x20] sm:$0xff] }
 0x8bf   :  { %v1193_v18 = vsub.f32 %v1180_v9, %v1191_v15  ;;  %v2911_v15 = vld [vmem:[%s3944_s7 + $0x10] sm:$0xff] }
 0x8c0   :  { %v1192_v20 = vsub.f32 %v1179_v10, %v1190_v17  ;;  %v2900_v17 = vld [vmem:[%s3968_s28 + $0x28] sm:$0xff] }
 0x8c1   :  { %v1195_v22 = vmul.f32 %v1193_v18, %v1193_v18 }
 0x8c2   :  { %v1194_v24 = vmul.f32 %v1192_v20, %v1192_v20 }
 0x8c3   :  { %v1199_v25 = vsel %vm99_vm2, %v1195_v22, 0.0 }
 0x8c4   :  { %1200 = vadd.xlane.f32.xlu0 %v1199_v25  ;;  %v1196_v5 = vsel %vm99_vm2, %v1194_v24, 0.0 }
 0x8c5   :  { %1197 = vadd.xlane.f32.xlu1 %v1196_v5 }
 0x951   :  { %v1201_v30 = vpop.xlane.xlu0 %1200 }
 0x952   :  { %v1203_v31 = vmul.f32 0.125, %v1201_v30  ;;  %v1198_v21 = vpop.xlane.xlu1 %1197 }
 0x953   :  { %v1202_v26 = vmul.f32 0.125, %v1198_v21 }
 0x954   :  { %v1205_v32 = vadd.f32 1e-05, %v1203_v31  ;;  %v2897_v31 = vld [vmem:[%s3955_s17] ss:$0 sm:$0xff] }
 0x955   :  { %v1204_v33 = vadd.f32 1e-05, %v1202_v26 }
 0x956   :  { %3375 = vrsqrt.f32 %v1205_v32 }
 0x957   :  { %3377 = vrsqrt.f32 %v1204_v33  ;;  %v2898_v33 = vld [vmem:[%s3956_s18] ss:$0 sm:$0xff] }
 0x960   :  { %v3376_v34 = vpop.eup %3375 }
 0x961   :  { %v3378_v36 = vpop.eup %3377  ;;  %v1209_v37 = vmul.f32 %v3376_v34, %v1193_v18  ;;  %v3308_v18 = vpack.c.bf16 %v2900_v17, %v2899_v16 }
 0x962   :  { %v1208_v39 = vmul.f32 %v3378_v36, %v1192_v20 }
 0x963   :  { %v1217_v41 = vmul.f32 %v2889_v35, %v1209_v37  ;;  %3309 = vmatprep.subr.bf16.mxu0 %v3308_v18 }
 0x964   :  { %v1216_v42 = vmul.f32 %v2889_v35, %v1208_v39  ;;  %3311 = vmatpush3.bf16.msra.mxu0 %v3308_v18 }
 0x965   :  { %v1225_v46 = vadd.f32 %v2890_v40, %v1217_v41 }
 0x966   :  { %v1224_v45 = vadd.f32 %v2890_v40, %v1216_v42 }
 0x968   :  { %3158 = vmatprep.mubr.msk.f32.mxu1 %vm99_vm2, %v1224_v45 }
 0x969   :  { %3159 = vmatmul.mubr.msk.f32.vlgmr.msra.gmra.mrb[10].mxu1 %vm99_vm2, %v1225_v46 }
 0x96a   :  { %3303 = vmatpush3.bf16.msra.mxu1 %v3300_v29  ;;  %v3312_v29 = vpack.c.bf16 %v2906_v28, %v2905_v27 }
 0x96b   :  { %3305 = vmatprep.subr.bf16.mxu1 %v3304_v49 }
 0x96c   :  { %3313 = vmatprep.subr.bf16.mxu0 %v3312_v29 }
 0x96e   :  { %3307 = vmatpush3.bf16.msra.mxu1 %v3304_v49 }
 0x96f   :  { %3186 = vmatprep.subr.mxu1 %v2911_v15 }
 0xa3c   :  { %v3160_v51 = vpop.f32.mrb[10].mxu1 }
 0xa3d   :  { %v1312_v52 = vadd.f32 %v3160_v51, %v2891_v50  ;;  %v1306_v53 = vpop.f32.mrb[11].mxu1 }
 0xa3e   :  { %v1307_v54 = vadd.f32 %v2891_v50, %v1306_v53 }
 0xa3f   :  { %v1316_v56 = vmax.f32 %v1312_v52, 0.0 }
 0xa40   :  { %v1315_v55 = vmax.f32 %v1307_v54, 0.0  ;;  %v2902_v54 = vld [vmem:[%s3942_s4 + $0x2] ss:$0 sm:$0xff] }
 0xa42   :  { %3169 = vmatprep.mubr.msk.f32.mxu1 %vm1328_vm10, %v1315_v55 }
 0xa43   :  { %3170 = vmatmul.mubr.msk.f32.vlgmr.msra.gmra.mrb[12].mxu1 %vm1328_vm10, %v1316_v56 }
 0xa44   :  { %3187 = vmatpush3.msra.mxu1 %v2911_v15 }
 0xb16   :  { %v3171_v58 = vpop.f32.mrb[12].mxu1 }
 0xb17   :  { %v1407_v59 = vadd.f32 %v3171_v58, %v2894_v57  ;;  %v1401_v60 = vpop.f32.mrb[13].mxu1  ;;  %v2908_v58 = vld [vmem:[%s3943_s6 + $0x2] ss:$0 sm:$0xff] }
 0xb18   :  { %v1402_v61 = vadd.f32 %v2894_v57, %v1401_v60 }
 0xb19   :  { %v1411_v62 = vadd.f32 %v1407_v59, %v1225_v46 }
 0xb1a   :  { %v1410_v63 = vadd.f32 %v1402_v61, %v1224_v45 }
 0xb1b   :  { %v1417_v0 = vsel %vm99_vm2, %v1411_v62, 0.0 }
 0xb1c   :  { %1418 = vadd.xlane.f32.xlu0 %v1417_v0  ;;  %v1414_v1 = vsel %vm99_vm2, %v1410_v63, 0.0 }
 0xb1d   :  { %1415 = vadd.xlane.f32.xlu1 %v1414_v1 }
 0xba9   :  { %v1419_v2 = vpop.xlane.xlu0 %1418 }
 0xbaa   :  { %v1421_v4 = vmul.f32 0.125, %v1419_v2  ;;  %v1416_v6 = vpop.xlane.xlu1 %1415 }
 0xbab   :  { %v1420_v7 = vmul.f32 0.125, %v1416_v6 }
 0xbac   :  { %v1423_v8 = vsub.f32 %v1411_v62, %v1421_v4  ;;  %v2929_v62 = vld [vmem:[%s3969_s21 + $0x30] sm:$0xff] }
 0xbad   :  { %v1422_v9 = vsub.f32 %v1410_v63, %v1420_v7  ;;  %v2930_v63 = vld [vmem:[%s3969_s21 + $0x38] sm:$0xff] }
 0xbae   :  { %v1425_v10 = vmul.f32 %v1423_v8, %v1423_v8  ;;  %v3330_v2 = vpack.c.bf16 %v2930_v63, %v2929_v62 }
 0xbaf   :  { %v1424_v11 = vmul.f32 %v1422_v9, %v1422_v9 }
 0xbb0   :  { %v1429_v12 = vsel %vm99_vm2, %v1425_v10, 0.0 }
 0xbb1   :  { %1430 = vadd.xlane.f32.xlu0 %v1429_v12  ;;  %v1426_v13 = vsel %vm99_vm2, %v1424_v11, 0.0  ;;  %v2932_v11 = vld [vmem:[%s3943_s6 + $0x3] ss:$0 sm:$0xff] }
 0xbb2   :  { %1427 = vadd.xlane.f32.xlu1 %v1426_v13 }
 0xc3e   :  { %v1431_v20 = vpop.xlane.xlu0 %1430 }
 0xc3f   :  { %v1433_v22 = vmul.f32 0.125, %v1431_v20  ;;  %v1428_v24 = vpop.xlane.xlu1 %1427 }
 0xc40   :  { %v1432_v25 = vmul.f32 0.125, %v1428_v24 }
 0xc41   :  { %v1435_v5 = vadd.f32 1e-05, %v1433_v22 }
 0xc42   :  { %v1434_v3 = vadd.f32 1e-05, %v1432_v25 }
 0xc43   :  { %3379 = vrsqrt.f32 %v1435_v5 }
 0xc44   :  { %3381 = vrsqrt.f32 %v1434_v3 }
 0xc4d   :  { %v3380_v30 = vpop.eup %3379 }
 0xc4e   :  { %v3382_v21 = vpop.eup %3381  ;;  %v1439_v26 = vmul.f32 %v3380_v30, %v1423_v8 }
 0xc4f   :  { %v1438_v32 = vmul.f32 %v3382_v21, %v1422_v9 }
 0xc50   :  { %v1447_v34 = vmul.f32 %v2897_v31, %v1439_v26 }
 0xc51   :  { %v1446_v35 = vmul.f32 %v2897_v31, %v1438_v32  ;;  %v2924_v31 = vld [vmem:[%s3968_s28 + $0x38] sm:$0xff] }
 0xc52   :  { %v3757_v36 = vadd.f32 %v2898_v33, %v1447_v34  ;;  %v3326_v21 = vpack.c.bf16 %v2924_v31, %v2923_v38 }
 0xc53   :  { %v3759_v37 = vadd.f32 %v2898_v33, %v1446_v35 }
 0xc54   :  { %1466 = vrot.lane.b32.xlu0 %v3757_v36, %s3408_s24  ;;  %v1457_v40 = vrot.slane %v3757_v36, 7 }
 0xc55   :  { %1464 = vrot.lane.b32.xlu1 %v3759_v37, %s3408_s24  ;;  %3188 = vmatprep.mubr.msk.f32.mxu1 %vm99_vm2, %v3759_v37  ;;  %v1456_v39 = vrot.slane %v3759_v37, 7 }
 0xc56   :  { %3189 = vmatmul.mubr.msk.f32.vlgmr.msra.gmra.mrb[14].mxu1 %vm99_vm2, %v3757_v36 }
 0xc57   :  { %v1459_v41 = vsel %vm74_vm3, %v1457_v40, %v1456_v39  ;;  %v1458_v42 = vsel %vm74_vm3, %v1456_v39, %v1457_v40  ;;  %v2935_v40 = vld [vmem:[%s3944_s7 + $0x18] sm:$0xff] }
 0xc58   :  { %v1460_v47 = vsel %vm87_vm4, %v1459_v41, 0.0  ;;  %v1461_v48 = vsel %vm88_vm6, %v1458_v42, 0.0 }
 0xcc6   :  { %v1467_v45 = vpop.permute.xlu0 %1466 }
 0xcc7   :  { %v1465_v46 = vpop.permute.xlu1 %1464  ;;  %v3783_v50 = vsel %vm99_vm2, %v1461_v48, %v1467_v45  ;;  %v2926_v45 = vld [vmem:[%s3942_s4 + $0x3] ss:$0 sm:$0xff] }
 0xcc8   :  { %v3780_v49 = vsel %vm99_vm2, %v1460_v47, %v1465_v46 }
 0xcc9   :  { %3176 = vmatprep.mubr.msk.f32.mxu0 %vm111_vm5, %v3780_v49 }
 0xcca   :  { %3177 = vmatmul.mubr.msk.f32.vlgmr.msra.gmra.mrb[12].mxu0 %vm111_vm5, %v3783_v50 }
 0xccb   :  { %3315 = vmatpush3.bf16.msra.mxu0 %v3312_v29  ;;  %3183 = vmatprep.mubr.msk.f32.mxu0 %vm111_vm5, %v3780_v49 }
 0xcce   :  { %3184 = vmatmul.mubr.msk.f32.vlgmr.msra.gmra.mrb[14].mxu0 %vm111_vm5, %v3783_v50 }
 0xd29   :  { %v3190_v19 = vpop.f32.mrb[14].mxu1 }
 0xd2a   :  { %v1736_v23 = vadd.f32 %v3190_v19, %v2913_v14  ;;  %v1730_v51 = vpop.f32.mrb[15].mxu1 }
 0xd2b   :  { %v1731_v52 = vadd.f32 %v2913_v14, %v1730_v51 }
 0xd2d   :  { %v3322_v53 = vpack.c.bf16 %v1736_v23, %v1731_v52 }
 0xd2f   :  { %3323 = vmatprep.subr.bf16.mxu1 %v3322_v53 }
 0xd30   :  { %3325 = vmatpush3.bf16.msra.mxu1 %v3322_v53 }
 0xd31   :  { %3327 = vmatprep.subr.bf16.mxu1 %v3326_v21 }
 0xd9d   :  { %v3178_v55 = vpop.f32.mrb[12].mxu0 }
 0xd9e   :  { %v1555_v56 = vpop.f32.mrb[13].mxu0  ;;  %v1561_v4 = vadd.f32 %v3178_v55, %v2902_v54 }
 0xd9f   :  { %v1556_v57 = vadd.f32 %v2902_v54, %v1555_v56 }
 0xda1   :  { %v3185_v59 = vpop.f32.mrb[14].mxu0  ;;  %3195 = vmatprep.mubr.msk.f32.mxu0 %vm99_vm2, %v1556_v57 }
 0xda2   :  { %v1647_v60 = vadd.f32 %v3185_v59, %v2908_v58  ;;  %v1641_v61 = vpop.f32.mrb[15].mxu0 }
 0xda3   :  { %v1642_v0 = vadd.f32 %v2908_v58, %v1641_v61 }
 0xda5   :  { %v3316_v1 = vpack.c.bf16 %v1647_v60, %v1642_v0 }
 0xda7   :  { %3318 = vmatprep.subr.msk.bf16.mxu0 %vm3591_vm7, %v3316_v1 }
 0xda8   :  { %3321 = vmatpush3.bf16.xpose.msk.msra.mxu0 %vm3591_vm7, %v3316_v1 }
 0xda9   :  { %3331 = vmatprep.subr.bf16.mxu0 %v3330_v2 }
 0xdaf   :  { %3196 = vmatmul.mubr.msk.f32.vlgmr.msra.gmra.mrb[16].mxu0 %vm99_vm2, %v1561_v4  ;;  %v2946_v4 = vld [vmem:[%s3947_s9 + $0x18] sm:$0xff] }
 0xdb0   :  { %3333 = vmatpush3.bf16.msra.mxu0 %v3330_v2  ;;  %3216 = vmatprep.mubr.msk.f32.mxu0 %vm111_vm5, %v3780_v49 }
 0xdb3   :  { %3217 = vmatmul.mubr.msk.f32.vlgmr.msra.gmra.mrb[18].mxu0 %vm111_vm5, %v3783_v50 }
 0xe82   :  { %v3197_v6 = vpop.f32.mrb[16].mxu0 }
 0xe83   :  { %v1827_v7 = vsel %vm67_vm8, %v3197_v6, -1e+09  ;;  %v1817_v8 = vpop.f32.mrb[17].mxu0 }
 0xe84   :  { %v1826_v9 = vsel %vm66_vm9, %v1817_v8, -1e+09  ;;  %v1831_v10 = vsel %vm111_vm5, %v1827_v7, -inf }
 0xe85   :  { %1832 = vmax.xlane.f32.xlu0 %v1831_v10  ;;  %v1828_v12 = vsel %vm111_vm5, %v1826_v9, -inf }
 0xe86   :  { %v3218_v13 = vpop.f32.mrb[18].mxu0  ;;  %1829 = vmax.xlane.f32.xlu1 %v1828_v12  ;;  %v2922_v12 = vld [vmem:[%s3947_s9 + $0x10] sm:$0xff] }
 0xe87   :  { %v2102_v15 = vadd.f32 %v3218_v13, %v2932_v11  ;;  %v2096_v16 = vpop.f32.mrb[19].mxu0 }
 0xe88   :  { %v2097_v17 = vadd.f32 %v2932_v11, %v2096_v16  ;;  %v2952_v16 = vld [vmem:[%s3948_s10 + $0x1] ss:$0 sm:$0xff] }
 0xe8a   :  { %v3334_v18 = vpack.c.bf16 %v2102_v15, %v2097_v17 }
 0xe8c   :  { %3336 = vmatprep.subr.msk.bf16.mxu0 %vm3591_vm7, %v3334_v18 }
 0xe8d   :  { %3339 = vmatpush3.bf16.xpose.msk.msra.mxu0 %vm3591_vm7, %v3334_v18 }
 0xf12   :  { %v1833_v20 = vpop.xlane.xlu0 %1832 }
 0xf13   :  { %v1835_v22 = vsub.f32 %v1827_v7, %v1833_v20  ;;  %v1830_v24 = vpop.xlane.xlu1 %1829 }
 0xf14   :  { %v1834_v25 = vsub.f32 %v1826_v9, %v1830_v24 }
 0xf15   :  { %v1838_v5 = vmul.f32 1.442695, %v1835_v22 }
 0xf16   :  { %v1836_v3 = vmul.f32 1.442695, %v1834_v25 }
 0xf17   :  { %3383 = vpow2.f32 %v1838_v5 }
 0xf18   :  { %3385 = vpow2.f32 %v1836_v3 }
 0xf21   :  { %v3384_v27 = vpop.eup %3383 }
 0xf22   :  { %v3386_v28 = vpop.eup %3385  ;;  %v1843_v29 = vsel %vm111_vm5, %v3384_v27, 0.0 }
 0xf23   :  { %1844 = vadd.xlane.f32.xlu0 %v1843_v29  ;;  %v1840_v30 = vsel %vm111_vm5, %v3386_v28, 0.0 }
 0xf24   :  { %1841 = vadd.xlane.f32.xlu1 %v1840_v30 }
 0xfb0   :  { %v1845_v26 = vpop.xlane.xlu0 %1844 }
 0xfb1   :  { %3387 = vrcp.f32 %v1845_v26  ;;  %v1842_v32 = vpop.xlane.xlu1 %1841 }
 0xfb2   :  { %3389 = vrcp.f32 %v1842_v32 }
 0xfbb   :  { %v3388_v33 = vpop.eup %3387 }
 0xfbc   :  { %v3390_v34 = vpop.eup %3389  ;;  %v1849_v39 = vmul.f32 %v3388_v33, %v3384_v27  ;;  %v2962_v33 = vld [vmem:[%s3950_s15 + $0x20] sm:$0xff] }
 0xfbd   :  { %v1848_v35 = vmul.f32 %v3390_v34, %v3386_v28  ;;  %v2963_v34 = vld [vmem:[%s3950_s15 + $0x28] sm:$0xff] }
 0xfbf   :  { %3202 = vmatprep.mubr.msk.f32.mxu1 %vm111_vm5, %v1848_v35  ;;  %v3344_v35 = vpack.c.bf16 %v2963_v34, %v2962_v33 }
 0xfc0   :  { %3203 = vmatmul.mubr.msk.f32.vlgmr.msra.gmra.mrb[16].mxu1 %vm111_vm5, %v1849_v39 }
 0xfc1   :  { %3329 = vmatpush3.bf16.msra.mxu1 %v3326_v21  ;;  %3209 = vmatprep.mubr.msk.f32.mxu1 %vm111_vm5, %v3780_v49  ;;  %v2937_v49 = vld [vmem:[%s3946_s8 + $0x3] ss:$0 sm:$0xff] }
 0xfc2   :  { %3219 = vmatprep.subr.mxu1 %v2935_v40 }
 0xfc4   :  { %3210 = vmatmul.mubr.msk.f32.vlgmr.msra.gmra.mrb[18].mxu1 %vm111_vm5, %v3783_v50 }
 0xfc5   :  { %3221 = vmatprep.mubr.msk.f32.mxu1 %vm99_vm2, %v3759_v37  ;;  %3220 = vmatpush3.msra.mxu1 %v2935_v40 }
 0xfc8   :  { %3222 = vmatmul.mubr.msk.f32.vlgmr.msra.gmra.mrb[20].mxu1 %vm99_vm2, %v3757_v36 }
0x1093   :  { %v3204_v41 = vpop.f32.mrb[16].mxu1 }
0x1094   :  { %v1922_v42 = vpop.f32.mrb[17].mxu1 }
0x1097   :  { %v3211_v46 = vpop.f32.mrb[18].mxu1 }
0x1098   :  { %v2010_v47 = vpop.f32.mrb[19].mxu1  ;;  %v2016_v50 = vadd.f32 %v3211_v46, %v2926_v45 }
0x1099   :  { %v2011_v48 = vadd.f32 %v2926_v45, %v2010_v47 }
0x109b   :  { %v3223_v14 = vpop.f32.mrb[20].mxu1  ;;  %3228 = vmatprep.mubr.msk.f32.mxu0 %vm99_vm2, %v2011_v48  ;;  %v2955_v48 = vld [vmem:[%s3951_s11 + $0x1] ss:$0 sm:$0xff] }
0x109c   :  { %v2187_v19 = vadd.f32 %v3223_v14, %v2937_v49  ;;  %v2181_v23 = vpop.f32.mrb[21].mxu1  ;;  %3229 = vmatmul.mubr.msk.f32.vlgmr.msra.gmra.mrb[20].mxu0 %vm99_vm2, %v2016_v50 }
0x109d   :  { %v2182_v51 = vadd.f32 %v2937_v49, %v2181_v23 }
0x109f   :  { %v3340_v52 = vpack.c.bf16 %v2187_v19, %v2182_v51  ;;  %v2956_v19 = vld [vmem:[%s3952_s12 + $0x1] ss:$0 sm:$0xff] }
0x10a1   :  { %3341 = vmatprep.subr.bf16.mxu1 %v3340_v52 }
0x10a2   :  { %3343 = vmatpush3.bf16.msra.mxu1 %v3340_v52 }
0x10a3   :  { %3238 = vmatprep.subr.mxu1 %v2946_v4 }
0x116f   :  { %v3230_v53 = vpop.f32.mrb[20].mxu0 }
0x1170   :  { %v2278_v54 = vsel %vm67_vm8, %v3230_v53, -1e+09  ;;  %v2268_v55 = vpop.f32.mrb[21].mxu0 }
0x1171   :  { %v2277_v56 = vsel %vm66_vm9, %v2268_v55, -1e+09  ;;  %v2282_v57 = vsel %vm111_vm5, %v2278_v54, -inf  ;;  %v2965_v55 = vld [vmem:[%s3950_s15 + $0x38] sm:$0xff] }
0x1172   :  { %2283 = vmax.xlane.f32.xlu0 %v2282_v57  ;;  %v2279_v58 = vsel %vm111_vm5, %v2277_v56, -inf  ;;  %v2959_v57 = vld [vmem:[%s3953_s14 + $0x1] ss:$0 sm:$0xff] }
0x1173   :  { %2280 = vmax.xlane.f32.xlu1 %v2279_v58 }
0x11ff   :  { %v2284_v59 = vpop.xlane.xlu0 %2283 }
0x1200   :  { %v2286_v60 = vsub.f32 %v2278_v54, %v2284_v59  ;;  %v2281_v61 = vpop.xlane.xlu1 %2280  ;;  %v2964_v54 = vld [vmem:[%s3950_s15 + $0x30] sm:$0xff] }
0x1201   :  { %v2285_v62 = vsub.f32 %v2277_v56, %v2281_v61  ;;  %v3348_v56 = vpack.c.bf16 %v2965_v55, %v2964_v54 }
0x1202   :  { %v2289_v63 = vmul.f32 1.442695, %v2286_v60 }
0x1203   :  { %v2287_v0 = vmul.f32 1.442695, %v2285_v62 }
0x1204   :  { %3391 = vpow2.f32 %v2289_v63 }
0x1205   :  { %3393 = vpow2.f32 %v2287_v0  ;;  %v2967_v0 = vld [vmem:[%s3954_s16 + $0x1] ss:$0 sm:$0xff] }
0x120e   :  { %v3392_v43 = vpop.eup %3391 }
0x120f   :  { %v3394_v1 = vpop.eup %3393  ;;  %v2294_v2 = vsel %vm111_vm5, %v3392_v43, 0.0 }
0x1210   :  { %2295 = vadd.xlane.f32.xlu0 %v2294_v2  ;;  %v2291_v44 = vsel %vm111_vm5, %v3394_v1, 0.0 }
0x1211   :  { %2292 = vadd.xlane.f32.xlu1 %v2291_v44 }
0x129d   :  { %v2296_v6 = vpop.xlane.xlu0 %2295 }
0x129e   :  { %3395 = vrcp.f32 %v2296_v6  ;;  %v2293_v7 = vpop.xlane.xlu1 %2292 }
0x129f   :  { %3397 = vrcp.f32 %v2293_v7 }
0x12a8   :  { %v3396_v8 = vpop.eup %3395 }
0x12a9   :  { %v3398_v9 = vpop.eup %3397  ;;  %v2300_v11 = vmul.f32 %v3396_v8, %v3392_v43 }
0x12aa   :  { %v2299_v10 = vmul.f32 %v3398_v9, %v3394_v1 }
0x12ac   :  { %3235 = vmatprep.mubr.msk.f32.mxu1 %vm111_vm5, %v2299_v10 }
0x12ad   :  { %3236 = vmatmul.mubr.msk.f32.vlgmr.msra.gmra.mrb[22].mxu1 %vm111_vm5, %v2300_v11 }
0x12ae   :  { %3239 = vmatpush3.msra.mxu1 %v2946_v4 }
0x12af   :  { %3243 = vmatprep.subr.mxu1 %v2922_v12 }
0x1380   :  { %v3237_v13 = vpop.f32.mrb[22].mxu1 }
0x1381   :  { %v2373_v15 = vpop.f32.mrb[23].mxu1 }
0x1382   :  { %3240 = vmatprep.mubr.msk.f32.mxu1 %vm99_vm2, %v2373_v15 }
0x1383   :  { %3241 = vmatmul.mubr.msk.f32.vlgmr.msra.gmra.mrb[24].mxu1 %vm99_vm2, %v3237_v13 }
0x1384   :  { %3244 = vmatpush3.msra.mxu1 %v2922_v12  ;;  %3245 = vmatprep.mubr.msk.f32.mxu1 %vm99_vm2, %v1922_v42 }
0x138b   :  { %3246 = vmatmul.mubr.msk.f32.vlgmr.msra.gmra.mrb[24].mxu1 %vm99_vm2, %v3204_v41 }
0x145e   :  { %v3247_v17 = vpop.f32.mrb[24].mxu1 }
0x145f   :  { %v2555_v18 = vadd.f32 %v3247_v17, %v2952_v16  ;;  %v2537_v20 = vpop.f32.mrb[25].mxu1 }
0x1460   :  { %v2554_v22 = vadd.f32 %v2952_v16, %v2537_v20 }
0x1461   :  { %v2557_v24 = vadd.f32 %v2555_v18, %v3757_v36 }
0x1462   :  { %v2556_v25 = vadd.f32 %v2554_v22, %v3759_v37  ;;  %v2957_v37 = vld [vmem:[%s3949_s13 + $0x8] sm:$0xff] }
0x1463   :  { %v2565_v5 = vsel %vm99_vm2, %v2557_v24, 0.0  ;;  %3248 = vmatprep.subr.mxu0 %v2957_v37 }
0x1464   :  { %2566 = vadd.xlane.f32.xlu0 %v2565_v5  ;;  %v2562_v3 = vsel %vm99_vm2, %v2556_v25, 0.0  ;;  %3249 = vmatpush3.msra.mxu0 %v2957_v37 }
0x1465   :  { %2563 = vadd.xlane.f32.xlu1 %v2562_v3  ;;  %3345 = vmatprep.subr.bf16.mxu0 %v3344_v35 }
0x14f1   :  { %v2567_v27 = vpop.xlane.xlu0 %2566 }
0x14f2   :  { %v2569_v28 = vmul.f32 0.125, %v2567_v27  ;;  %v2564_v29 = vpop.xlane.xlu1 %2563 }
0x14f3   :  { %v2568_v30 = vmul.f32 0.125, %v2564_v29  ;;  %v2972_v29 = vld [vmem:[%s3955_s17 + $0x1] ss:$0 sm:$0xff] }
0x14f4   :  { %v2571_v38 = vsub.f32 %v2557_v24, %v2569_v28 }
0x14f5   :  { %v2570_v31 = vsub.f32 %v2556_v25, %v2568_v30 }
0x14f6   :  { %v2573_v21 = vmul.f32 %v2571_v38, %v2571_v38 }
0x14f7   :  { %v2572_v26 = vmul.f32 %v2570_v31, %v2570_v31 }
0x14f8   :  { %v2577_v32 = vsel %vm99_vm2, %v2573_v21, 0.0 }
0x14f9   :  { %2578 = vadd.xlane.f32.xlu0 %v2577_v32  ;;  %v2574_v36 = vsel %vm99_vm2, %v2572_v26, 0.0 }
0x14fa   :  { %2575 = vadd.xlane.f32.xlu1 %v2574_v36 }
0x1586   :  { %v2579_v39 = vpop.xlane.xlu0 %2578 }
0x1587   :  { %v2581_v40 = vmul.f32 0.125, %v2579_v39  ;;  %v2576_v41 = vpop.xlane.xlu1 %2575 }
0x1588   :  { %v2580_v42 = vmul.f32 0.125, %v2576_v41 }
0x1589   :  { %v2583_v45 = vadd.f32 1e-05, %v2581_v40 }
0x158a   :  { %v2582_v46 = vadd.f32 1e-05, %v2580_v42 }
0x158b   :  { %3399 = vrsqrt.f32 %v2583_v45 }
0x158c   :  { %3401 = vrsqrt.f32 %v2582_v46 }
0x1595   :  { %v3400_v47 = vpop.eup %3399 }
0x1596   :  { %v3402_v49 = vpop.eup %3401  ;;  %v2587_v50 = vmul.f32 %v3400_v47, %v2571_v38 }
0x1597   :  { %v2586_v14 = vmul.f32 %v3402_v49, %v2570_v31  ;;  %v2973_v31 = vld [vmem:[%s3956_s18 + $0x1] ss:$0 sm:$0xff] }
0x1598   :  { %v2595_v23 = vmul.f32 %v2955_v48, %v2587_v50 }
0x1599   :  { %v2594_v51 = vmul.f32 %v2955_v48, %v2586_v14 }
0x159a   :  { %v2603_v53 = vadd.f32 %v2956_v19, %v2595_v23 }
0x159b   :  { %v2602_v52 = vadd.f32 %v2956_v19, %v2594_v51 }
0x159d   :  { %3250 = vmatprep.mubr.msk.f32.mxu0 %vm99_vm2, %v2602_v52 }
0x159e   :  { %3251 = vmatmul.mubr.msk.f32.vlgmr.msra.gmra.mrb[22].mxu0 %vm99_vm2, %v2603_v53 }
0x159f   :  { %3347 = vmatpush3.bf16.msra.mxu0 %v3344_v35 }
0x15a0   :  { %3349 = vmatprep.subr.bf16.mxu0 %v3348_v56 }
0x15a3   :  { %3351 = vmatpush3.bf16.msra.mxu0 %v3348_v56 }
0x1671   :  { %v3252_v58 = vpop.f32.mrb[22].mxu0 }
0x1672   :  { %v2692_v59 = vadd.f32 %v3252_v58, %v2959_v57  ;;  %v2686_v60 = vpop.f32.mrb[23].mxu0 }
0x1673   :  { %v2687_v61 = vadd.f32 %v2959_v57, %v2686_v60 }
0x1674   :  { %v2696_v63 = vmax.f32 %v2692_v59, 0.0 }
0x1675   :  { %v2695_v62 = vmax.f32 %v2687_v61, 0.0 }
0x1677   :  { %3261 = vmatprep.mubr.msk.f32.mxu0 %vm1328_vm10, %v2695_v62 }
0x1678   :  { %3262 = vmatmul.mubr.msk.f32.vlgmr.msra.gmra.mrb[24].mxu0 %vm1328_vm10, %v2696_v63 }
0x174b   :  { %v3263_v43 = vpop.f32.mrb[24].mxu0 }
0x174c   :  { %v2788_v1 = vadd.f32 %v3263_v43, %v2967_v0  ;;  %v2782_v2 = vpop.f32.mrb[25].mxu0 }
0x174d   :  { %v2783_v44 = vadd.f32 %v2967_v0, %v2782_v2 }
0x174e   :  { %v2792_v4 = vadd.f32 %v2788_v1, %v2603_v53 }
0x174f   :  { %v2791_v6 = vadd.f32 %v2783_v44, %v2602_v52 }
0x1750   :  { %v2800_v7 = vsel %vm99_vm2, %v2792_v4, 0.0 }
0x1751   :  { %2801 = vadd.xlane.f32.xlu0 %v2800_v7  ;;  %v2797_v8 = vsel %vm99_vm2, %v2791_v6, 0.0 }
0x1752   :  { %2798 = vadd.xlane.f32.xlu1 %v2797_v8 }
0x17de   :  { %v2802_v9 = vpop.xlane.xlu0 %2801 }
0x17df   :  { %v2804_v10 = vmul.f32 0.125, %v2802_v9  ;;  %v2799_v11 = vpop.xlane.xlu1 %2798 }
0x17e0   :  { %v2803_v12 = vmul.f32 0.125, %v2799_v11 }
0x17e1   :  { %v2806_v13 = vsub.f32 %v2792_v4, %v2804_v10 }
0x17e2   :  { %v2805_v15 = vsub.f32 %v2791_v6, %v2803_v12 }
0x17e3   :  { %v2808_v16 = vmul.f32 %v2806_v13, %v2806_v13 }
0x17e4   :  { %v2807_v17 = vmul.f32 %v2805_v15, %v2805_v15 }
0x17e5   :  { %v2812_v18 = vsel %vm99_vm2, %v2808_v16, 0.0 }
0x17e6   :  { %2813 = vadd.xlane.f32.xlu0 %v2812_v18  ;;  %v2809_v20 = vsel %vm99_vm2, %v2807_v17, 0.0 }
0x17e7   :  { %2810 = vadd.xlane.f32.xlu1 %v2809_v20 }
0x1873   :  { %v2814_v22 = vpop.xlane.xlu0 %2813 }
0x1874   :  { %v2816_v24 = vmul.f32 0.125, %v2814_v22  ;;  %v2811_v25 = vpop.xlane.xlu1 %2810 }
0x1875   :  { %v2815_v5 = vmul.f32 0.125, %v2811_v25 }
0x1876   :  { %v2818_v3 = vadd.f32 1e-05, %v2816_v24 }
0x1877   :  { %v2817_v27 = vadd.f32 1e-05, %v2815_v5 }
0x1878   :  { %3403 = vrsqrt.f32 %v2818_v3 }
0x1879   :  { %3405 = vrsqrt.f32 %v2817_v27 }
0x1882   :  { %v3404_v28 = vpop.eup %3403 }
0x1883   :  { %v3406_v30 = vpop.eup %3405  ;;  %v2822_v38 = vmul.f32 %v3404_v28, %v2806_v13 }
0x1884   :  { %v2821_v21 = vmul.f32 %v3406_v30, %v2805_v15 }
0x1885   :  { %v2830_v26 = vmul.f32 %v2972_v29, %v2822_v38 }
0x1886   :  { %v2829_v32 = vmul.f32 %v2972_v29, %v2821_v21 }
0x1887   :  { %v2838_v36 = vadd.f32 %v2973_v31, %v2830_v26 }
0x1888   :  { %v2837_v37 = vadd.f32 %v2973_v31, %v2829_v32 }
0x1889   :  { %2840 = vst.msk [vmem:[%s3957_s19 + $0x8] sm:$0xff] %vm99_vm2, %v2838_v36 }
0x188a   :  { %2839 = vst.msk [vmem:[%s3957_s19] sm:$0xff] %vm99_vm2, %v2837_v37 }

</bundles_post_ra>
